<compile_context>
chip_gen: v7x
topology: tpu7x:2x2x1
jax: 0.10.0
libtpu: 0.0.40
codegen_flags: <defaults>
</compile_context>

<pallas_src>
import jax
import jax.numpy as jnp
from jax.experimental import pallas as pl
from jax.experimental.pallas import tpu as pltpu


def _round_up(x, m):
    return (x + m - 1) // m * m


# --------------------------- Pallas kernels ---------------------------

def _gemm_kernel(a_ref, b_ref, o_ref, acc_ref):
    """bf16 x bf16 -> f32 accumulate on the MXU."""
    k = pl.program_id(2)

    @pl.when(k == 0)
    def _():
        acc_ref[...] = jnp.zeros_like(acc_ref)

    acc_ref[...] += jnp.dot(a_ref[...], b_ref[...],
                            preferred_element_type=jnp.float32)

    @pl.when(k == pl.num_programs(2) - 1)
    def _():
        o_ref[...] = acc_ref[...].astype(o_ref.dtype)


def pallas_matmul_bf16(a, b_padded, n_valid, tm, tn, tk):
    """a: [M, K] float32 activations, b_padded: [Kp, Np] bf16 pre-padded weight
    (tk | Kp, tn | Np, zero-padded beyond the logical K x n_valid block).
    Returns f32 [M, n_valid]."""
    M, K = a.shape
    Kp, Np = b_padded.shape
    assert Kp % tk == 0 and Np % tn == 0 and Kp >= K

    tm = min(tm, _round_up(M, 8))
    Mp = _round_up(M, tm)
    # Cast activations to bf16 first, then pad (half the pad bytes).
    a_p = jnp.pad(a.astype(jnp.bfloat16), ((0, Mp - M), (0, Kp - K)))

    grid = (Mp // tm, Np // tn, Kp // tk)
    out = pl.pallas_call(
        _gemm_kernel,
        out_shape=jax.ShapeDtypeStruct((Mp, Np), jnp.float32),
        grid_spec=pltpu.PrefetchScalarGridSpec(
            num_scalar_prefetch=0,
            grid=grid,
            in_specs=[
                pl.BlockSpec((tm, tk), lambda i, j, k: (i, k)),
                pl.BlockSpec((tk, tn), lambda i, j, k: (k, j)),
            ],
            out_specs=pl.BlockSpec((tm, tn), lambda i, j, k: (i, j)),
            scratch_shapes=[pltpu.VMEM((tm, tn), jnp.float32)],
        ),
        compiler_params=pltpu.CompilerParams(
            dimension_semantics=("parallel", "parallel", "arbitrary")),
    )(a_p, b_padded)
    return out[:M, :n_valid]


def _bn_elu_kernel(x_ref, scale_ref, shift_ref, o_ref):
    y = x_ref[...] * scale_ref[...] + shift_ref[...]
    # ELU(alpha=1): y if y > 0 else exp(y) - 1  (clamp exp arg for safety)
    o_ref[...] = jnp.where(y > 0, y, jnp.exp(jnp.minimum(y, 0.0)) - 1.0)


def pallas_bn_elu(x, scale, shift, tm=512):
    """x: [M, C] f32; scale/shift: [C].  y = ELU(x*scale + shift), fused."""
    M, C = x.shape
    tm = min(tm, _round_up(M, 8))
    Mp = _round_up(M, tm)
    x_p = jnp.pad(x, ((0, Mp - M), (0, 0)))
    out = pl.pallas_call(
        _bn_elu_kernel,
        out_shape=jax.ShapeDtypeStruct((Mp, C), jnp.float32),
        grid_spec=pltpu.PrefetchScalarGridSpec(
            num_scalar_prefetch=0,
            grid=(Mp // tm,),
            in_specs=[
                pl.BlockSpec((tm, C), lambda i: (i, 0)),
                pl.BlockSpec((1, C), lambda i: (0, 0)),
                pl.BlockSpec((1, C), lambda i: (0, 0)),
            ],
            out_specs=pl.BlockSpec((tm, C), lambda i: (i, 0)),
        ),
        compiler_params=pltpu.CompilerParams(
            dimension_semantics=("parallel",)),
    )(x_p, scale.reshape(1, C), shift.reshape(1, C))
    return out[:M]


# --------------------------- glue (plain JAX) ---------------------------

def deconv_im2col_nhwc(x_nhwc, stride, ksize, pad, out_pad):
    """Transposed-conv input prep: zero-dilate by `stride`, edge-pad by
    (ksize-1-pad) (+out_pad on the high side), then extract ksize x ksize
    patches with stride 1.  Returns patches [N*Ho*Wo, ksize*ksize*C] with the
    reduction axis ordered (kh, kw, c), plus (Ho, Wo)."""
    # TODO(synk): im2col kept as plain-JAX glue; an implicit-im2col Pallas
    # kernel (25 shifted [M,Cin]@[Cin,Cout] accumulations in VMEM) would avoid
    # materializing the zero-dilated patch slab at large batch sizes.
    N, H, W, C = x_nhwc.shape
    lo = ksize - 1 - pad
    hi = ksize - 1 - pad + out_pad
    xp = jax.lax.pad(x_nhwc, jnp.float32(0.0),
                     ((0, 0, 0), (lo, hi, stride - 1), (lo, hi, stride - 1), (0, 0, 0)))
    Hp, Wp = xp.shape[1], xp.shape[2]
    Ho = Hp - ksize + 1
    Wo = Wp - ksize + 1
    cols = []
    for kh in range(ksize):
        for kw in range(ksize):
            cols.append(xp[:, kh:kh + Ho, kw:kw + Wo, :])
    col = jnp.stack(cols, axis=3)                       # [N, Ho, Wo, 25, C]
    col = col.reshape(N * Ho * Wo, ksize * ksize * C)   # K ordered (kh, kw, c)
    return col, Ho, Wo


def make_deconv_block(key, ch_in, ch_out, stride, output_padding=0, padding=2,
                      ksize=5):
    """Builds torch-equivalent parameters and the pre-transposed / pre-padded
    bf16 GEMM weight (done once, outside the forward)."""
    k1, k2, k3, k4 = jax.random.split(key, 4)
    # torch ConvTranspose2d weight layout: (Cin, Cout, kH, kW)
    w = jax.random.normal(k1, (ch_in, ch_out, ksize, ksize), jnp.float32) \
        / jnp.sqrt(ch_in * ksize * ksize)
    b = 0.01 * jax.random.normal(k2, (ch_out,), jnp.float32)
    gamma = 1.0 + 0.1 * jax.random.normal(k3, (ch_out,), jnp.float32)
    beta = 0.1 * jax.random.normal(k4, (ch_out,), jnp.float32)

    Kdim = ksize * ksize * ch_in
    # Tile choice: single k step for these K sizes, >=2 parallel M blocks.
    tm = 256
    tn = min(512, _round_up(ch_out, 128))
    tk = min(2048, _round_up(Kdim, 128))
    Kp = _round_up(Kdim, tk)
    Np = _round_up(ch_out, tn)

    # Transposed conv == correlation with the spatially flipped, (ci,co)-swapped
    # kernel over the dilated/padded input.  Reduction order (kh, kw, ci).
    wf = jnp.flip(w, axis=(2, 3))
    w_gemm = wf.transpose(2, 3, 0, 1).reshape(Kdim, ch_out)
    w_gemm = jnp.pad(w_gemm, ((0, Kp - Kdim), (0, Np - ch_out))).astype(jnp.bfloat16)

    return dict(w=w, b=b, gamma=gamma, beta=beta, w_gemm=w_gemm,
                stride=stride, output_padding=output_padding, padding=padding,
                ksize=ksize, ch_out=ch_out, tiles=(tm, tn, tk))


def deconv_block_forward(x_nchw, block):
    """ConvTranspose2d(5x5) + BatchNorm2d (train-mode batch stats) + ELU."""
    stride = block["stride"]
    out_pad = block["output_padding"]
    pad = block["padding"]
    ksize = block["ksize"]
    ch_out = block["ch_out"]
    tm, tn, tk = block["tiles"]

    N = x_nchw.shape[0]
    x_nhwc = jnp.transpose(x_nchw, (0, 2, 3, 1))       # single boundary transpose
    col, Ho, Wo = deconv_im2col_nhwc(x_nhwc, stride, ksize, pad, out_pad)

    y = pallas_matmul_bf16(col, block["w_gemm"], ch_out, tm, tn, tk)  # [M, Cout]
    # NOTE: the ConvTranspose2d bias is intentionally NOT added: train-mode
    # BatchNorm subtracts the per-channel batch mean, which cancels it exactly.

    # TODO(synk): per-channel mean/var reduction kept as plain-JAX glue (tiny).
    mean = jnp.mean(y, axis=0)
    var = jnp.var(y, axis=0)                 # biased, matches torch train-mode BN
    inv = block["gamma"] / jnp.sqrt(var + 1e-5)
    scale = inv
    shift = block["beta"] - mean * inv

    out = pallas_bn_elu(y, scale, shift)                               # fused BN + ELU
    out = out.reshape(N, Ho, Wo, ch_out).transpose(0, 3, 1, 2)         # back to NCHW
    return out


# Pure-JAX f32 reference (keeps the conv bias, which must cancel under BN).
def reference_forward(x, block):
    w, b, gamma, beta = block["w"], block["b"], block["gamma"], block["beta"]
    s, op, pad, K = block["stride"], block["output_padding"], block["padding"], block["ksize"]
    wf = jnp.flip(w, (2, 3)).transpose(1, 0, 2, 3)      # [Cout, Cin, K, K]
    lo = K - 1 - pad
    hi = K - 1 - pad + op
    y = jax.lax.conv_general_dilated(
        x, wf, window_strides=(1, 1), padding=((lo, hi), (lo, hi)),
        lhs_dilation=(s, s), dimension_numbers=("NCHW", "OIHW", "NCHW"),
        precision=jax.lax.Precision.HIGHEST) + b[None, :, None, None]
    mean = jnp.mean(y, axis=(0, 2, 3), keepdims=True)
    var = jnp.var(y, axis=(0, 2, 3), keepdims=True)
    yn = (y - mean) / jnp.sqrt(var + 1e-5) * gamma[None, :, None, None] \
         + beta[None, :, None, None]
    return jnp.where(yn > 0, yn, jnp.exp(jnp.minimum(yn, 0.0)) - 1.0)


if __name__ == "__main__":
    key = jax.random.PRNGKey(0)
    k_blocks, k_inputs = jax.random.split(key)

    # (ch_in, ch_out, H=W, stride, output_padding): upsampling and stride-1 cases.
    configs = [
        (64, 128, 8, 2, 1),    # 8x8 -> 16x16 (typical VAE decoder upsample)
        (64, 128, 16, 1, 0),   # 16x16 -> 16x16
    ]

    for idx, (ci, co, H, s, op) in enumerate(configs):
        kp = jax.random.fold_in(k_blocks, idx)
        kx = jax.random.fold_in(k_inputs, idx)
        block = make_deconv_block(kp, ci, co, stride=s, output_padding=op)

        x = jax.random.normal(kx, (2, ci, H, H), jnp.float32)
        out = deconv_block_forward(x, block)
        jax.block_until_ready(out)

        ref = reference_forward(x, block)
        expected_hw = (H - 1) * s - 2 * 2 + 5 + op
        assert out.shape == (2, co, expected_hw, expected_hw), out.shape
        assert out.shape == ref.shape
        assert jnp.allclose(out, ref, atol=2e-2, rtol=2e-2), (
            f"config {idx}: max abs err {jnp.max(jnp.abs(out - ref))}")

    print("KERNEL_OK")
</pallas_src>

<mosaic_0001>
module attributes {stable_mosaic.version = 11 : i64} {
  func.func @_gemm_kernel(%arg0: i32, %arg1: i32, %arg2: i32, %arg3: memref<256x1664xbf16, #tpu.memory_space<vmem>>, %arg4: memref<1664x128xbf16, #tpu.memory_space<vmem>>, %arg5: memref<256x128xf32, #tpu.memory_space<vmem>>, %arg6: memref<256x128xf32, #tpu.memory_space<vmem>>) attributes {dimension_semantics = [#tpu.dimension_semantics<parallel>, #tpu.dimension_semantics<parallel>, #tpu.dimension_semantics<arbitrary>], iteration_bounds = array<i64: 2, 1, 1>, scalar_prefetch = 0 : i64, scratch_operands = 1 : i64, tpu.core_type = #tpu.core_type<tc>, window_params = [{transform_indices = @transform_0, window_bounds = array<i64: 256, 1664>}, {transform_indices = @transform_1, window_bounds = array<i64: 1664, 128>}, {transform_indices = @transform_2, window_bounds = array<i64: 256, 128>}]} {
    %c0_i32 = arith.constant 0 : i32
    %0 = arith.cmpi eq, %arg2, %c0_i32 : i32
    %1 = arith.extui %0 : i1 to i32
    %c0_i32_0 = arith.constant 0 : i32
    %2 = arith.cmpi ne, %1, %c0_i32_0 : i32
    scf.if %2 {
      %cst_10 = arith.constant 0.000000e+00 : f32
      %12 = vector.broadcast %cst_10 : f32 to vector<256x128xf32>
      %c0_11 = arith.constant 0 : index
      %c0_12 = arith.constant 0 : index
      %13 = vector.load %arg6[%c0_11, %c0_12] : memref<256x128xf32, #tpu.memory_space<vmem>>, vector<256x128xf32>
      tpu.vector_store %arg6[%c0_11, %c0_12], %12 {strides = array<i32>} : memref<256x128xf32, #tpu.memory_space<vmem>>, vector<256x128xf32>,
    } else {
    }
    %c0 = arith.constant 0 : index
    %c0_1 = arith.constant 0 : index
    %3 = vector.load %arg6[%c0, %c0_1] : memref<256x128xf32, #tpu.memory_space<vmem>>, vector<256x128xf32>
    %c0_2 = arith.constant 0 : index
    %c0_3 = arith.constant 0 : index
    %4 = vector.load %arg3[%c0_2, %c0_3] : memref<256x1664xbf16, #tpu.memory_space<vmem>>, vector<256x1664xbf16>
    %c0_4 = arith.constant 0 : index
    %c0_5 = arith.constant 0 : index
    %5 = vector.load %arg4[%c0_4, %c0_5] : memref<1664x128xbf16, #tpu.memory_space<vmem>>, vector<1664x128xbf16>
    %cst = arith.constant dense<0.000000e+00> : vector<256x128xf32>
    %6 = tpu.matmul %4, %5, %cst {dimension_numbers = #tpu.dot_dimension_numbers<[1], [0], [0], [1], [0, 0, 1, 1], [], []>} : vector<256x1664xbf16>, vector<1664x128xbf16>, vector<256x128xf32> -> vector<256x128xf32>
    %7 = arith.addf %3, %6 : vector<256x128xf32>
    %c0_6 = arith.constant 0 : index
    %c0_7 = arith.constant 0 : index
    %8 = vector.load %arg6[%c0_6, %c0_7] : memref<256x128xf32, #tpu.memory_space<vmem>>, vector<256x128xf32>
    tpu.vector_store %arg6[%c0_6, %c0_7], %7 {strides = array<i32>} : memref<256x128xf32, #tpu.memory_space<vmem>>, vector<256x128xf32>,
    %c0_i32_8 = arith.constant 0 : i32
    %9 = arith.cmpi eq, %arg2, %c0_i32_8 : i32
    %10 = arith.extui %9 : i1 to i32
    %c0_i32_9 = arith.constant 0 : i32
    %11 = arith.cmpi ne, %10, %c0_i32_9 : i32
    scf.if %11 {
      %c0_10 = arith.constant 0 : index
      %c0_11 = arith.constant 0 : index
      %12 = vector.load %arg6[%c0_10, %c0_11] : memref<256x128xf32, #tpu.memory_space<vmem>>, vector<256x128xf32>
      %c0_12 = arith.constant 0 : index
      %c0_13 = arith.constant 0 : index
      %13 = vector.load %arg5[%c0_12, %c0_13] : memref<256x128xf32, #tpu.memory_space<vmem>>, vector<256x128xf32>
      tpu.vector_store %arg5[%c0_12, %c0_13], %12 {strides = array<i32>} : memref<256x128xf32, #tpu.memory_space<vmem>>, vector<256x128xf32>,
    } else {
    }
    return
  }
  func.func @transform_0(%arg0: i32, %arg1: i32, %arg2: i32) -> (i32, i32) {
    %c0_i32 = arith.constant 0 : i32
    return %arg0, %arg2 : i32, i32
  }
  func.func @transform_1(%arg0: i32, %arg1: i32, %arg2: i32) -> (i32, i32) {
    %c0_i32 = arith.constant 0 : i32
    return %arg2, %arg1 : i32, i32
  }
  func.func @transform_2(%arg0: i32, %arg1: i32, %arg2: i32) -> (i32, i32) {
    %c0_i32 = arith.constant 0 : i32
    return %arg0, %arg1 : i32, i32
  }
}

</mosaic_0001>

<bundles_post_ra>
// kernel: tpu_custom_call.1
= control target key start
LH: loop header
LB: loop body
LE: loop exit
PB: predicated region body
PF: predicated region fallthrough
CT: control target
= control target key end

     0   :  { %7 = vsyncpa [#allocation4], 0  ;;  %s6521_s0 = inlined_call_operand.hbm [shape: bf16[512,1664], index: 0, kind: input, shape index: {}]   ;;  %s6522_s1 = inlined_call_operand.hbm [shape: bf16[1664,128], index: 1, kind: input, shape index: {}]   ;;  %s6523_s2 = inlined_call_operand.hbm [shape: f32[512,128], index: 2, kind: output, shape index: {}]  }
   0x1   :  { %9 = vsyncpa [#allocation4 + $0x1], 0 }
   0x2   :  { %10 = vsyncpa [#allocation7], 0 }
   0x3   :  { %11 = vsyncpa [#allocation5], 0 }
   0x4   :  { %13 = vsyncpa [#allocation5 + $0x1], 0  ;;  %s5524_s9 = smov 0   ;;  %s5526_s10 = smov 0  }
   0x5   :  { %s5528_s11 = smov 0   ;;  %s5530_s12 = smov 0  }
   0x6   :  { %s5532_s13 = smov 0   ;;  %s5534_s14 = smov 0  }
   0x7 LB: > { %s3775_s15 = sadd.s32 4294967295, %s5498_s14   ;;  %s3776_s16 = sadd.s32 4294967294, %s5498_s14   ;;  %s5498_s14 = sphi %s5534_s14, %s19_s14   ;;  %s5494_s13 = sphi %s5532_s13, %s6546_s13   ;;  %s5490_s12 = sphi %s5530_s12, %s6545_s12   ;;  %s5486_s11 = sphi %s5528_s11, %s6544_s11   ;;  %s5482_s10 = sphi %s5526_s10, %s6543_s10   ;;  %s5478_s9 = sphi %s5524_s9, %s6542_s9  }
   0x8   : > { %p60_p0 = scmp.ne.s32.totalorder %s5482_s10, %s5478_s9  ;;  %p5558_p1 = scmp.eq.s32.totalorder %s3775_s15, 0 }
   0x9   : > { %p5562_p2 = scmp.eq.s32.totalorder %s3775_s15, 1  ;;  %p120_p3 = scmp.eq.s32.totalorder %s3776_s16, 1 }
   0xa   : > { %s6528_s17 = scalar_select %p5558_p1, 1, 0 }
   0xb   : > { %s6529_s18 = scalar_select %p5562_p2, 1, 0 }
   0xc   : > { %p5568_p4 = por %p5558_p1, %p60_p0  ;;  %p3777_p5 = scmp.ge.s32.totalorder %s5498_s14, 1 }
   0xd   : > { %p5573_p6 = por %p120_p3, %p60_p0  ;;  %p127_p7 = scmp.lt.s32.totalorder %s5498_s14, 3 }
   0xe   : > { %s6530_s19 = scalar_select %p5568_p4, 1, 0 }
   0xf   : > { %s6531_s20 = scalar_select %p5573_p6, 1, 0 }
  0x10   : > { %p5578_p8 = pnand %p3777_p5, %p127_p7  ;;  %s5500_s22 = smov [#allocation6]  }
  0x11   : > { %s143_s23 = sshll.u32 %s5500_s22, 4  ;;  %s38_s25 = sadd.s32 1, %s5494_s13  ;;  %s144_s23 = int_to_ptr.vmem [resolvable:$true] %s143_s23 }
  0x12   : > { %s6532_s21 = scalar_select %p5578_p8, 1, 0 }
  0x13   : > { %p4875_p9 = pneg %p5578_p8  ;;  %s5354_s28 = scalar_lea.hbm %s6522_s1, 13312 }
  0x14   : > { %p5355_p12 = scmp.ne.s32.totalorder %s6522_s1, %s5354_s28  ;;  %p5361_p5 = scmp.lt.u32.totalorder %s5354_s28, %s6522_s1 }
  0x15   : > { %p5587_p11 = pnand %p4875_p9, %p5558_p1 }
  0x17   : > { %p5356_p13 = pneg %p5587_p11 }
  0x19   : > { %p5357_p0 = pnand %p5356_p13, %p5355_p12 }
  0x1b   : > { %p5358_p3 = pneg %p5357_p0 }
  0x1d   : > { %p5363_p7 = pnand %p5361_p5, %p5358_p3 }
  0x1f   : > { %5366 = shalt.err (!%p5363_p7)
}
  0x20   : > { %s5367_s5 = scalar_lea.vmem %s144_s23, 13312  ;;  %p5375_p1 = scmp.lt.s32.totalorder %s144_s23, %s144_s23 }
  0x21   : > { %p5368_p9 = scmp.ne.s32.totalorder %s144_s23, %s5367_s5  ;;  %p5376_p4 = scmp.lt.s32.totalorder %s5367_s5, %s5367_s5 }
  0x23   : > { %p5370_p10 = pnand %p5368_p9, %p5356_p13  ;;  %p5377_p8 = por %p5376_p4, %p5375_p1 }
  0x25   : > { %p5371_p6 = pneg %p5370_p10 }
  0x27   : > { %p5378_p2 = pnand %p5377_p8, %p5371_p6 }
  0x29   : > { %5381 = shalt.err (!%p5378_p2)
}
  0x2a   : > { %s5501_s6 = smov 64   ;;  %s5502_s7 = smov 4  }
  0x2b   : > { %4878 = dma.hbm_to_vmem [thread:$0]  (!%p5587_p11), %s6522_s1, 13312, %s144_s23, [#allocation7], %s5501_s6, %s5501_s6, %s5502_s7  }
  0x2c   : > { %p40_p1 = scmp.ge.s32.totalorder %s38_s25, 2  ;;  %s47_s16 = sadd.s32 1, %s5486_s11 }
  0x2d   : > { %p54_p2 = scmp.ne.s32.totalorder %s5486_s11, %s5482_s10  ;;  %p55_p4 = scmp.eq.s32.totalorder %s5498_s14, 0 }
  0x2e   : > { %s6548_s25 = smov (%p40_p1, %s38_s25), 0  ;;  %p6534_p8 = scmp.ne.s32.totalorder %s6529_s18, 0 }
  0x2f   : > { %p56_p6 = por %p55_p4, %p54_p2  ;;  %s42_s26 = ssub.s32 %s5494_s13, %s6548_s25 }
  0x30   : > { %p5616_p10 = por %p6534_p8, %p54_p2  ;;  %p4888_p12 = scmp.lt.s32.totalorder %s5498_s14, 2 }
  0x31   : > { %p45_p13 = scmp.eq.s32.totalorder %s42_s26, 0  ;;  %s157_s24 = sand.u32 1, %s5486_s11  }
  0x32   : > { %s4864_s27 = smul.u32 1664, %s157_s24  ;;  %p5628_p11 = pnand %p4888_p12, %p56_p6 }
  0x33   : > { %s5625_s28 = scalar_select %p45_p13, %s5486_s11, %s47_s16  }
  0x34   : > { %s4865_s23 = smul.u32 26624, %s5494_s13  ;;  %s161_s29 = scalar_lea.vmem [#allocation3], %s4864_s27 }
  0x35   : > { %s171_s30 = sshll.u32 %s161_s29, 4  ;;  %s5639_s6 = scalar_lea.sflag [#allocation4], %s157_s24  ;;  %s5637_s30 = int_to_ptr.vmem [resolvable:$true] %s171_s30 }
  0x36   : > { %s5635_s5 = scalar_lea.hbm %s6521_s0, %s4865_s23  ;;  %p5384_p3 = pneg %p5628_p11 }
  0x37   : > { %s5382_s7 = scalar_lea.hbm %s5635_s5, 26624  ;;  %s5387_s16 = scalar_lea.hbm %s6521_s0, 53248 }
  0x38   : > { %p5383_p0 = scmp.ne.s32.totalorder %s5635_s5, %s5382_s7  ;;  %p5388_p9 = scmp.lt.u32.totalorder %s5635_s5, %s6521_s0 }
  0x39   : > { %p5389_p1 = scmp.lt.u32.totalorder %s5387_s16, %s5382_s7  ;;  %p5391_p4 = scmp.lt.u32.totalorder %s5382_s7, %s5635_s5 }
  0x3a   : > { %p5385_p5 = pnand %p5384_p3, %p5383_p0 }
  0x3b   : > { %p5390_p2 = por %p5389_p1, %p5388_p9 }
  0x3c   : > { %p5386_p7 = pneg %p5385_p5 }
  0x3d   : > { %p5392_p6 = por %p5391_p4, %p5390_p2 }
  0x3f   : > { %p5393_p8 = pnand %p5392_p6, %p5386_p7 }
  0x41   : > { %5396 = shalt.err (!%p5393_p8)
}
  0x42   : > { %s5397_s24 = scalar_lea.vmem %s5637_s30, 26624  ;;  %s5503_s23 = smov [#allocation3]  }
  0x43   : > { %p5398_p12 = scmp.ne.s32.totalorder %s5637_s30, %s5397_s24  ;;  %s5402_s29 = sshll.u32 %s5503_s23, 4  ;;  %s5403_s29 = int_to_ptr.vmem [resolvable:$false] %s5402_s29 }
  0x44   : > { %s5404_s4 = scalar_lea.vmem %s5403_s29, 53248  ;;  %p5405_p5 = scmp.lt.s32.totalorder %s5637_s30, %s5403_s29 }
  0x45   : > { %p5400_p13 = pnand %p5398_p12, %p5384_p3  ;;  %p5406_p9 = scmp.lt.s32.totalorder %s5404_s4, %s5397_s24 }
  0x47   : > { %p5401_p0 = pneg %p5400_p13  ;;  %p5407_p1 = por %p5406_p9, %p5405_p5 }
  0x49   : > { %p5408_p2 = pnand %p5407_p1, %p5401_p0 }
  0x4b   : > { %5411 = shalt.err (!%p5408_p2)
}
  0x4c   : > { %s5504_s18 = smov 832   ;;  %s5505_s7 = smov 52  }
  0x4d   : > { %4882 = dma.hbm_to_vmem [thread:$0]  (!%p5628_p11), %s5635_s5, 26624, %s5637_s30, %s5639_s6, %s5504_s18, %s5504_s18, %s5505_s7  }
  0x4e   : > { %p6537_p3 = scmp.ne.s32.totalorder %s6532_s21, 0 }
  0x4f   : > { %s5670_s8 = sand.u32 (!%p6537_p3), 1, %s5482_s10   ;;  %p6538_p7 = scmp.ne.s32.totalorder (!%p6537_p3), %s6530_s19, 0 }
  0x50   : > { %183 = sbr.rel (%p6537_p3) target bundleno = 768 (0x300), region = 28  ;;  %s186_s16 = scalar_lea.sflag (!%p6537_p3), [#allocation4], %s5670_s8 }
  0x51   : > { %s4866_s15 = smul.u32 (!%p6537_p3), 1664, %s5670_s8 }
  0x53   : > { %s5674_s26 = scalar_lea.vmem (!%p6537_p3), [#allocation3], %s4866_s15 }
  0x57   : > { %5465 = dma.done.wait (%p6538_p7), %s186_s16, 26624  }
  0x58   : > { %5467 = vsyncadd (%p6538_p7), %s186_s16, 4294940672  ;;  %p6539_p11 = scmp.ne.s32.totalorder %s6528_s17, 0 }
  0x5a   : > { %5469 = dma.done.wait (%p6539_p11), [#allocation7], 13312  }
  0x5b   : > { %5471 = vsyncadd (%p6539_p11), [#allocation7], 4294953984  ;;  %v4946_v0 = vld [vmem:[#allocation6 + $0x40] sm:$0xff]   ;;  %v4948_v2 = vld [vmem:[#allocation6 + $0x48] sm:$0xff]   ;;  %s3785_s17 = sshll.u32 %s5670_s8, 8  ;;  %s4103_s21 = sshll.u32 %s5490_s12, 12 }
  0x5c   : > { %v4947_v1 = vld [vmem:[#allocation6] sm:$0xff]   ;;  %4104 = vmatprep.subr.bf16.mxu0 %v4946_v0  ;;  %4848 = vmatprep.subr.bf16.mxu1 %v4946_v0  ;;  %v4949_v3 = vld [vmem:[#allocation6 + $0x8] sm:$0xff]   ;;  %v4950_v4 = vld [vmem:[#allocation6 + $0x50] sm:$0xff]   ;;  %s6395_s19 = scalar_lea.vmem [#allocation8], %s3785_s17  ;;  %s6468_s6 = scalar_lea.hbm %s6523_s2, %s4103_s21 }
  0x5d   : > { %4105 = vmatpush3.bf16.msra.mxu0 %v4947_v1  ;;  %4856 = vmatpush3.bf16.msra.mxu1 %v4947_v1  ;;  %v4951_v5 = vld [vmem:[#allocation6 + $0x10] sm:$0xff]   ;;  %v4952_v6 = vld [vmem:[#allocation6 + $0x58] sm:$0xff]   ;;  %v4954_v8 = vld [vmem:[#allocation6 + $0x60] sm:$0xff]   ;;  %s3672_s30 = sshll.u32 %s6395_s19, 4  ;;  %s3658_s27 = scalar_lea.sflag [#allocation5], %s5670_s8  ;;  %s6470_s30 = int_to_ptr.vmem [resolvable:$true] %s3672_s30 }
  0x5e   : > { %4106 = vmatprep.subr.bf16.mxu0 %v4948_v2  ;;  %4849 = vmatprep.subr.bf16.mxu1 %v4948_v2  ;;  %v4953_v7 = vld [vmem:[#allocation6 + $0x18] sm:$0xff]   ;;  %v4955_v9 = vld [vmem:[#allocation6 + $0x20] sm:$0xff]   ;;  %v4956_v10 = vld [vmem:[#allocation6 + $0x68] sm:$0xff]   ;;  %s5412_s12 = scalar_lea.vmem %s6470_s30, 4096  ;;  %s5506_s24 = smov [#allocation8]  }
  0x5f   : > { %v4964_v11 = vld [vmem:[%s5674_s26 + $0x4] ss:$52 sps:$4 sm:$0xff]   ;;  %v4957_v13 = vld [vmem:[#allocation6 + $0x28] sm:$0xff]   ;;  %v4958_v14 = vld [vmem:[#allocation6 + $0x70] sm:$0xff]   ;;  %p5413_p4 = scmp.ne.s32.totalorder %s6470_s30, %s5412_s12  ;;  %s5416_s23 = sshll.u32 %s5506_s24, 4  ;;  %s5417_s23 = int_to_ptr.vmem [resolvable:$false] %s5416_s23 }
  0x60   : > { %v4967_v12 = vld [vmem:[%s5674_s26 + $0x4e4] ss:$52 sps:$4 sm:$0xff]   ;;  %2431 = vmatprep.mubr.bf16.mxu0 %v4964_v11  ;;  %v4959_v15 = vld [vmem:[#allocation6 + $0x30] sm:$0xff]   ;;  %v4970_v23 = vld [vmem:[#allocation6 + $0xc8] sm:$0xff]   ;;  %s5418_s29 = scalar_lea.vmem %s5417_s23, 8192  ;;  %p5419_p12 = scmp.lt.s32.totalorder %s6470_s30, %s5417_s23 }
  0x61   : > { %4107 = vmatpush3.bf16.msra.mxu0 %v4949_v3  ;;  %4857 = vmatpush3.bf16.msra.mxu1 %v4949_v3  ;;  %v4960_v16 = vld [vmem:[#allocation6 + $0x78] sm:$0xff]   ;;  %v4968_v18 = vld [vmem:[#allocation6 + $0xc0] sm:$0xff]   ;;  %v4972_v27 = vld [vmem:[#allocation6 + $0x88] sm:$0xff]   ;;  %p5414_p6 = pnand %p5413_p4, %p5616_p10  ;;  %p5420_p13 = scmp.lt.s32.totalorder %s5418_s29, %s5412_s12 }
  0x62   : > { %4108 = vmatprep.subr.bf16.mxu0 %v4950_v4  ;;  %4850 = vmatprep.subr.bf16.mxu1 %v4950_v4  ;;  %v4961_v17 = vld [vmem:[#allocation6 + $0x38] sm:$0xff]   ;;  %v4962_v19 = vld [vmem:[%s5674_s26] ss:$52 sps:$4 sm:$0xff]   ;;  %v4991_v28 = vld [vmem:[#allocation6 + $0x148] sm:$0xff]  }
  0x63   : > { %2527 = vmatprep.mubr.bf16.mxu1 %v4967_v12  ;;  %v4965_v20 = vld [vmem:[%s5674_s26 + $0x4e0] ss:$52 sps:$4 sm:$0xff]   ;;  %v4978_v29 = vld [vmem:[%s5674_s26 + $0x68] ss:$52 sps:$4 sm:$0xff]   ;;  %v4988_v38 = vld [vmem:[%s5674_s26 + $0xd0] ss:$52 sps:$4 sm:$0xff]   ;;  %p5415_p8 = pneg %p5414_p6  ;;  %p5421_p0 = por %p5420_p13, %p5419_p12 }
  0x64   : > { %v4971_v21 = vld [vmem:[#allocation6 + $0x140] sm:$0xff]   ;;  %v4979_v30 = vld [vmem:[%s5674_s26 + $0x548] ss:$52 sps:$4 sm:$0xff]   ;;  %v4980_v31 = vld [vmem:[#allocation6 + $0xd0] sm:$0xff]  }
  0x65   : > { %4109 = vmatpush3.bf16.msra.mxu0 %v4951_v5  ;;  %4858 = vmatpush3.bf16.msra.mxu1 %v4951_v5  ;;  %v4969_v22 = vld [vmem:[#allocation6 + $0x80] sm:$0xff]   ;;  %v4981_v32 = vld [vmem:[#allocation6 + $0x90] sm:$0xff]   ;;  %v4993_v33 = vld [vmem:[#allocation6 + $0x108] sm:$0xff]   ;;  %p5422_p5 = pnand %p5421_p0, %p5415_p8 }
  0x66   : > { %4110 = vmatprep.subr.bf16.mxu0 %v4952_v6  ;;  %4851 = vmatprep.subr.bf16.mxu1 %v4952_v6  ;;  %v4973_v24 = vld [vmem:[#allocation6 + $0x100] sm:$0xff]   ;;  %v4982_v34 = vld [vmem:[#allocation6 + $0xd8] sm:$0xff]   ;;  %v4984_v35 = vld [vmem:[%s5674_s26 + $0xd4] ss:$52 sps:$4 sm:$0xff]  }
  0x67   : > { %v4974_v25 = vld [vmem:[%s5674_s26 + $0x6c] ss:$52 sps:$4 sm:$0xff]   ;;  %v4986_v36 = vld [vmem:[%s5674_s26 + $0x5b4] ss:$52 sps:$4 sm:$0xff]   ;;  %v4983_v37 = vld [vmem:[#allocation6 + $0x98] sm:$0xff]  }
  0x68   : > { %v4976_v26 = vld [vmem:[%s5674_s26 + $0x54c] ss:$52 sps:$4 sm:$0xff]   ;;  %v4989_v39 = vld [vmem:[%s5674_s26 + $0x5b0] ss:$52 sps:$4 sm:$0xff]   ;;  %v5004_v52 = vld [vmem:[#allocation6 + $0xf8] sm:$0xff]  }
  0x69   : > { %4111 = vmatpush3.bf16.msra.mxu0 %v4953_v7  ;;  %4859 = vmatpush3.bf16.msra.mxu1 %v4953_v7  ;;  %v4990_v40 = vld [vmem:[#allocation6 + $0xe0] sm:$0xff]   ;;  %v4994_v42 = vld [vmem:[#allocation6 + $0xe8] sm:$0xff]   ;;  %v5005_v43 = vld [vmem:[#allocation6 + $0x150] sm:$0xff]  }
  0x6a   : > { %4112 = vmatprep.subr.bf16.mxu0 %v4954_v8  ;;  %4852 = vmatprep.subr.bf16.mxu1 %v4954_v8  ;;  %v4992_v41 = vld [vmem:[#allocation6 + $0xa0] sm:$0xff]   ;;  %v4996_v44 = vld [vmem:[%s5674_s26 + $0x13c] ss:$52 sps:$4 sm:$0xff]   ;;  %v4995_v47 = vld [vmem:[#allocation6 + $0xa8] sm:$0xff]  }
  0x6b   : > { %v4998_v45 = vld [vmem:[%s5674_s26 + $0x61c] ss:$52 sps:$4 sm:$0xff]   ;;  %v5000_v49 = vld [vmem:[%s5674_s26 + $0x138] ss:$52 sps:$4 sm:$0xff]   ;;  %v5013_v59 = vld [vmem:[%s5674_s26 + $0x1a0] ss:$52 sps:$4 sm:$0xff]  }
  0x6c   : > { %v5007_v46 = vld [vmem:[#allocation6 + $0x110] sm:$0xff]   ;;  %v5001_v50 = vld [vmem:[%s5674_s26 + $0x618] ss:$52 sps:$4 sm:$0xff]   ;;  %v5010_v58 = vld [vmem:[%s5674_s26 + $0x8] ss:$52 sps:$4 sm:$0xff]  }
  0x6d   : > { %4113 = vmatpush3.bf16.msra.mxu0 %v4955_v9  ;;  %4860 = vmatpush3.bf16.msra.mxu1 %v4955_v9  ;;  %v5002_v48 = vld [vmem:[#allocation6 + $0xf0] sm:$0xff]   ;;  %v5008_v53 = vld [vmem:[%s5674_s26 + $0x1a4] ss:$52 sps:$4 sm:$0xff]   ;;  %v5012_v54 = vld [vmem:[%s5674_s26 + $0xc] ss:$52 sps:$4 sm:$0xff]  }
  0x6e   : > { %4114 = vmatprep.subr.bf16.mxu0 %v4956_v10  ;;  %4853 = vmatprep.subr.bf16.mxu1 %v4956_v10  ;;  %v5003_v51 = vld [vmem:[#allocation6 + $0xb0] sm:$0xff]   ;;  %v5022_v55 = vld [vmem:[#allocation6 + $0x158] sm:$0xff]   ;;  %v5014_v60 = vld [vmem:[#allocation6 + $0x1c0] sm:$0xff]  }
  0x6f   : > { %v5023_v56 = vld [vmem:[#allocation6 + $0x118] sm:$0xff]   ;;  %v5015_v61 = vld [vmem:[#allocation6 + $0x180] sm:$0xff]   ;;  %v5018_v63 = vld [vmem:[%s5674_s26 + $0x74] ss:$52 sps:$4 sm:$0xff]  }
  0x70   : > { %v5006_v57 = vld [vmem:[#allocation6 + $0xb8] sm:$0xff]   ;;  %v5016_v62 = vld [vmem:[%s5674_s26 + $0x20c] ss:$52 sps:$4 sm:$0xff]   ;;  %v5021_v5 = vld [vmem:[%s5674_s26 + $0x70] ss:$52 sps:$4 sm:$0xff]  }
  0x71   : > { %4115 = vmatpush3.bf16.msra.mxu0 %v4957_v13  ;;  %4861 = vmatpush3.bf16.msra.mxu1 %v4957_v13  ;;  %v5032_v0 = vld [vmem:[#allocation6 + $0x160] sm:$0xff]   ;;  %v5030_v1 = vld [vmem:[#allocation6 + $0x1c8] sm:$0xff]   ;;  %v5026_v7 = vld [vmem:[%s5674_s26 + $0xdc] ss:$52 sps:$4 sm:$0xff]  }
  0x72   : > { %4116 = vmatprep.subr.bf16.mxu0 %v4958_v14  ;;  %4854 = vmatprep.subr.bf16.mxu1 %v4958_v14  ;;  %v5033_v2 = vld [vmem:[#allocation6 + $0x120] sm:$0xff]   ;;  %v5031_v3 = vld [vmem:[#allocation6 + $0x188] sm:$0xff]   ;;  %v5047_v9 = vld [vmem:[#allocation6 + $0x1d0] sm:$0xff]  }
  0x73   : > { %v5020_v4 = vld [vmem:[%s5674_s26 + $0x208] ss:$52 sps:$4 sm:$0xff]   ;;  %v5049_v11 = vld [vmem:[#allocation6 + $0x190] sm:$0xff]   ;;  %v5029_v13 = vld [vmem:[%s5674_s26 + $0xd8] ss:$52 sps:$4 sm:$0xff]  }
  0x74   : > { %v5024_v6 = vld [vmem:[%s5674_s26 + $0x274] ss:$52 sps:$4 sm:$0xff]   ;;  %v5028_v12 = vld [vmem:[%s5674_s26 + $0x270] ss:$52 sps:$4 sm:$0xff]  }
  0x75   : > { %4117 = vmatpush3.bf16.msra.mxu0 %v4959_v15  ;;  %4862 = vmatpush3.bf16.msra.mxu1 %v4959_v15  ;;  %v5046_v8 = vld [vmem:[#allocation6 + $0x168] sm:$0xff]   ;;  %v5034_v14 = vld [vmem:[%s5674_s26 + $0x2dc] ss:$52 sps:$4 sm:$0xff]  }
  0x76   : > { %4118 = vmatprep.subr.bf16.mxu0 %v4960_v16  ;;  %4855 = vmatprep.subr.bf16.mxu1 %v4960_v16  ;;  %v5048_v10 = vld [vmem:[#allocation6 + $0x128] sm:$0xff]   ;;  %v5056_v15 = vld [vmem:[#allocation6 + $0x170] sm:$0xff]  }
  0x77   : > { %v5057_v16 = vld [vmem:[#allocation6 + $0x130] sm:$0xff]  }
  0x79   : > { %4119 = vmatpush3.bf16.msra.mxu0 %v4961_v17  ;;  %4863 = vmatpush3.bf16.msra.mxu1 %v4961_v17  ;;  %v5036_v17 = vld [vmem:[%s5674_s26 + $0x144] ss:$52 sps:$4 sm:$0xff]  }
  0x7a   : > { %4216 = vmatprep.subr.bf16.mxu1 %v4968_v18  ;;  %4328 = vmatprep.subr.bf16.mxu0 %v4971_v21  ;;  %v5064_v18 = vld [vmem:[#allocation6 + $0x1d8] sm:$0xff]   ;;  %v5039_v21 = vld [vmem:[%s5674_s26 + $0x140] ss:$52 sps:$4 sm:$0xff]  }
  0x7c   : > { %2432 = vmatmul.mubr.bf16.vlgmr.msra.gmra.mrb[0].mxu0 %v4962_v19  ;;  %2528 = vmatmul.mubr.bf16.vlgmr.msra.gmra.mrb[0].mxu1 %v4965_v20  ;;  %v5065_v19 = vld [vmem:[#allocation6 + $0x198] sm:$0xff]  }
  0x7d   : > { %4217 = vmatpush3.bf16.msra.mxu1 %v4969_v22  ;;  %4329 = vmatpush3.bf16.msra.mxu0 %v4973_v24  ;;  %v5038_v20 = vld [vmem:[%s5674_s26 + $0x2d8] ss:$52 sps:$4 sm:$0xff]  }
  0x7e   : > { %4218 = vmatprep.subr.bf16.mxu1 %v4970_v23  ;;  %2439 = vmatprep.mubr.bf16.mxu0 %v4974_v25  ;;  %v5040_v22 = vld [vmem:[%s5674_s26 + $0x344] ss:$52 sps:$4 sm:$0xff]   ;;  %v5042_v23 = vld [vmem:[%s5674_s26 + $0x1ac] ss:$52 sps:$4 sm:$0xff]  }
  0x7f   : > { %2535 = vmatprep.mubr.bf16.mxu1 %v4976_v26  ;;  %4330 = vmatprep.subr.bf16.mxu0 %v4991_v28  ;;  %v5072_v24 = vld [vmem:[#allocation6 + $0x178] sm:$0xff]   ;;  %v5080_v26 = vld [vmem:[#allocation6 + $0x1e0] sm:$0xff]  }
  0x80   : > { %v5073_v25 = vld [vmem:[#allocation6 + $0x138] sm:$0xff]  }
  0x81   : > { %4219 = vmatpush3.bf16.msra.mxu1 %v4972_v27  ;;  %4331 = vmatpush3.bf16.msra.mxu0 %v4993_v33  ;;  %v5044_v27 = vld [vmem:[%s5674_s26 + $0x340] ss:$52 sps:$4 sm:$0xff]   ;;  %v5045_v28 = vld [vmem:[%s5674_s26 + $0x1a8] ss:$52 sps:$4 sm:$0xff]  }
  0x82   : > { %4220 = vmatprep.subr.bf16.mxu1 %v4980_v31  ;;  %4332 = vmatprep.subr.bf16.mxu0 %v5005_v43  ;;  %v5050_v31 = vld [vmem:[%s5674_s26 + $0x3ac] ss:$52 sps:$4 sm:$0xff]   ;;  %v5054_v33 = vld [vmem:[%s5674_s26 + $0x3a8] ss:$52 sps:$4 sm:$0xff]   ;;  %v5112_v43 = vld [vmem:[#allocation6 + $0x1f0] sm:$0xff]  }
  0x84   : > { %2440 = vmatmul.mubr.bf16.gmra.mrb[4].mxu0 %v4978_v29  ;;  %2536 = vmatmul.mubr.bf16.gmra.mrb[4].mxu1 %v4979_v30  ;;  %v5081_v29 = vld [vmem:[#allocation6 + $0x1a0] sm:$0xff]  }
  0x85   : > { %4221 = vmatpush3.bf16.msra.mxu1 %v4981_v32  ;;  %2447 = vmatprep.mubr.bf16.mxu0 %v4984_v35  ;;  %v5082_v30 = vld [vmem:[#allocation6 + $0x240] sm:$0xff]   ;;  %v5052_v32 = vld [vmem:[%s5674_s26 + $0x214] ss:$52 sps:$4 sm:$0xff]  }
  0x86   : > { %4222 = vmatprep.subr.bf16.mxu1 %v4982_v34  ;;  %2543 = vmatprep.mubr.bf16.mxu1 %v4986_v36  ;;  %v5055_v34 = vld [vmem:[%s5674_s26 + $0x210] ss:$52 sps:$4 sm:$0xff]   ;;  %v5096_v35 = vld [vmem:[#allocation6 + $0x1e8] sm:$0xff]  }
  0x87   : > { %4333 = vmatpush3.bf16.msra.mxu0 %v5007_v46  ;;  %v5097_v36 = vld [vmem:[#allocation6 + $0x1a8] sm:$0xff]   ;;  %v5071_v46 = vld [vmem:[%s5674_s26 + $0x2e0] ss:$52 sps:$4 sm:$0xff]  }
  0x88   : > { %4334 = vmatprep.subr.bf16.mxu0 %v5022_v55  ;;  %v5086_v55 = vld [vmem:[%s5674_s26 + $0x7c] ss:$52 sps:$4 sm:$0xff]  }
  0x89   : > { %4223 = vmatpush3.bf16.msra.mxu1 %v4983_v37  ;;  %v5058_v37 = vld [vmem:[%s5674_s26 + $0x414] ss:$52 sps:$4 sm:$0xff]  }
  0x8a   : > { %4224 = vmatprep.subr.bf16.mxu1 %v4990_v40  ;;  %v5063_v40 = vld [vmem:[%s5674_s26 + $0x278] ss:$52 sps:$4 sm:$0xff]  }
  0x8b   : > { %4335 = vmatpush3.bf16.msra.mxu0 %v5023_v56  ;;  %v5098_v56 = vld [vmem:[#allocation6 + $0x248] sm:$0xff]  }
  0x8c   : > { %2448 = vmatmul.mubr.bf16.gmra.mrb[8].mxu0 %v4988_v38  ;;  %2544 = vmatmul.mubr.bf16.gmra.mrb[8].mxu1 %v4989_v39  ;;  %v5060_v38 = vld [vmem:[%s5674_s26 + $0x27c] ss:$52 sps:$4 sm:$0xff]  }
  0x8d   : > { %4225 = vmatpush3.bf16.msra.mxu1 %v4992_v41  ;;  %2455 = vmatprep.mubr.bf16.mxu0 %v4996_v44  ;;  %v5062_v39 = vld [vmem:[%s5674_s26 + $0x410] ss:$52 sps:$4 sm:$0xff]  }
  0x8e   : > { %4226 = vmatprep.subr.bf16.mxu1 %v4994_v42  ;;  %2551 = vmatprep.mubr.bf16.mxu1 %v4998_v45  ;;  %v5066_v41 = vld [vmem:[%s5674_s26 + $0x47c] ss:$52 sps:$4 sm:$0xff]   ;;  %v5068_v42 = vld [vmem:[%s5674_s26 + $0x2e4] ss:$52 sps:$4 sm:$0xff]  }
  0x8f   : > { %4336 = vmatprep.subr.bf16.mxu0 %v5032_v0  ;;  %v5113_v44 = vld [vmem:[#allocation6 + $0x1b0] sm:$0xff]   ;;  %v5070_v45 = vld [vmem:[%s5674_s26 + $0x478] ss:$52 sps:$4 sm:$0xff]  }
  0x90   : > { %4337 = vmatpush3.bf16.msra.mxu0 %v5033_v2  ;;  %v5115_v0 = vld [vmem:[#allocation6 + $0x210] sm:$0xff]   ;;  %v5094_v2 = vld [vmem:[%s5674_s26 + $0x418] ss:$52 sps:$4 sm:$0xff]  }
  0x91   : > { %4227 = vmatpush3.bf16.msra.mxu1 %v4995_v47  ;;  %4338 = vmatprep.subr.bf16.mxu0 %v5046_v8  ;;  %v5074_v47 = vld [vmem:[%s5674_s26 + $0x34c] ss:$52 sps:$4 sm:$0xff]  }
  0x92   : > { %4228 = vmatprep.subr.bf16.mxu1 %v5002_v48  ;;  %v5078_v48 = vld [vmem:[%s5674_s26 + $0x14] ss:$52 sps:$4 sm:$0xff]   ;;  %v5147_v8 = vld [vmem:[#allocation6 + $0x220] sm:$0xff]  }
  0x94   : > { %2456 = vmatmul.mubr.bf16.gmra.mrb[12].mxu0 %v5000_v49  ;;  %2552 = vmatmul.mubr.bf16.gmra.mrb[12].mxu1 %v5001_v50  ;;  %v5128_v49 = vld [vmem:[#allocation6 + $0x1f8] sm:$0xff]  }
  0x95   : > { %4229 = vmatpush3.bf16.msra.mxu1 %v5003_v51  ;;  %2463 = vmatprep.mubr.bf16.mxu0 %v5008_v53  ;;  %v5129_v50 = vld [vmem:[#allocation6 + $0x1b8] sm:$0xff]   ;;  %v5076_v51 = vld [vmem:[%s5674_s26 + $0x10] ss:$52 sps:$4 sm:$0xff]  }
  0x96   : > { %4230 = vmatprep.subr.bf16.mxu1 %v5004_v52  ;;  %2592 = vmatprep.mubr.bf16.mxu1 %v5012_v54  ;;  %v5079_v52 = vld [vmem:[%s5674_s26 + $0x348] ss:$52 sps:$4 sm:$0xff]   ;;  %v5083_v53 = vld [vmem:[#allocation6 + $0x200] sm:$0xff]  }
  0x97   : > { %4339 = vmatpush3.bf16.msra.mxu0 %v5048_v10  ;;  %v5084_v54 = vld [vmem:[%s5674_s26 + $0x3b4] ss:$52 sps:$4 sm:$0xff]  }
  0x98   : > { %4340 = vmatprep.subr.bf16.mxu0 %v5056_v15  ;;  %v5104_v10 = vld [vmem:[%s5674_s26 + $0x480] ss:$52 sps:$4 sm:$0xff]  }
  0x99   : > { %4231 = vmatpush3.bf16.msra.mxu1 %v5006_v57  ;;  %v5144_v57 = vld [vmem:[#allocation6 + $0x2c0] sm:$0xff]   ;;  %v5108_v15 = vld [vmem:[%s5674_s26 + $0x1b4] ss:$52 sps:$4 sm:$0xff]  }
  0x9a   : > { %4440 = vmatprep.subr.bf16.mxu1 %v5014_v60  ;;  %v5088_v60 = vld [vmem:[%s5674_s26 + $0x3b0] ss:$52 sps:$4 sm:$0xff]  }
  0x9b   : > { %4341 = vmatpush3.bf16.msra.mxu0 %v5057_v16  ;;  %v5179_v16 = vld [vmem:[#allocation6 + $0x230] sm:$0xff]  }
  0x9c   : > { %2464 = vmatmul.mubr.bf16.gmra.mrb[16].mxu0 %v5013_v59  ;;  %2593 = vmatmul.mubr.bf16.vlgmr.msra.gmra.mrb[16].mxu1 %v5010_v58  ;;  %v5099_v58 = vld [vmem:[#allocation6 + $0x208] sm:$0xff]   ;;  %v5114_v59 = vld [vmem:[#allocation6 + $0x250] sm:$0xff]  }
  0x9d   : > { %4441 = vmatpush3.bf16.msra.mxu1 %v5015_v61  ;;  %2471 = vmatprep.mubr.bf16.mxu0 %v5016_v62  ;;  %v5089_v61 = vld [vmem:[%s5674_s26 + $0x78] ss:$52 sps:$4 sm:$0xff]   ;;  %v5090_v62 = vld [vmem:[%s5674_s26 + $0x41c] ss:$52 sps:$4 sm:$0xff]  }
  0x9e   : > { %2600 = vmatprep.mubr.bf16.mxu1 %v5018_v63  ;;  %4442 = vmatprep.subr.bf16.mxu1 %v5030_v1  ;;  %v5092_v63 = vld [vmem:[%s5674_s26 + $0xe4] ss:$52 sps:$4 sm:$0xff]  }
  0x9f   : > { %4342 = vmatprep.subr.bf16.mxu0 %v5072_v24  ;;  %v5130_v1 = vld [vmem:[#allocation6 + $0x258] sm:$0xff]  }
  0xa0   : > { %4343 = vmatpush3.bf16.msra.mxu0 %v5073_v25  ;;  %v5121_v24 = vld [vmem:[%s5674_s26 + $0x218] ss:$52 sps:$4 sm:$0xff]   ;;  %v5122_v25 = vld [vmem:[%s5674_s26 + $0x5bc] ss:$52 sps:$4 sm:$0xff]  }
  0xa1   : > { %4443 = vmatpush3.bf16.msra.mxu1 %v5031_v3  ;;  %4552 = vmatprep.subr.bf16.mxu0 %v5082_v30  ;;  %v5131_v3 = vld [vmem:[#allocation6 + $0x218] sm:$0xff]  }
  0xa2   : > { %4444 = vmatprep.subr.bf16.mxu1 %v5047_v9  ;;  %v5162_v9 = vld [vmem:[#allocation6 + $0x268] sm:$0xff]   ;;  %v5132_v30 = vld [vmem:[%s5674_s26 + $0x624] ss:$52 sps:$4 sm:$0xff]  }
  0xa4   : > { %2472 = vmatmul.mubr.bf16.gmra.mrb[20].mxu0 %v5020_v4  ;;  %2601 = vmatmul.mubr.bf16.gmra.mrb[20].mxu1 %v5021_v5  ;;  %v5146_v4 = vld [vmem:[#allocation6 + $0x260] sm:$0xff]  }
  0xa5   : > { %2479 = vmatprep.mubr.bf16.mxu0 %v5024_v6  ;;  %2608 = vmatprep.mubr.bf16.mxu1 %v5026_v7  ;;  %v5095_v5 = vld [vmem:[%s5674_s26 + $0xe0] ss:$52 sps:$4 sm:$0xff]   ;;  %v5100_v6 = vld [vmem:[%s5674_s26 + $0x484] ss:$52 sps:$4 sm:$0xff]  }
  0xa6   : > { %4445 = vmatpush3.bf16.msra.mxu1 %v5049_v11  ;;  %v5102_v7 = vld [vmem:[%s5674_s26 + $0x14c] ss:$52 sps:$4 sm:$0xff]   ;;  %v5105_v11 = vld [vmem:[%s5674_s26 + $0x148] ss:$52 sps:$4 sm:$0xff]  }
  0xa7   : > { %4446 = vmatprep.subr.bf16.mxu1 %v5064_v18  ;;  %v5111_v18 = vld [vmem:[%s5674_s26 + $0x1b0] ss:$52 sps:$4 sm:$0xff]  }
  0xaa   : > { %4447 = vmatpush3.bf16.msra.mxu1 %v5065_v19  ;;  %v5116_v19 = vld [vmem:[%s5674_s26 + $0x554] ss:$52 sps:$4 sm:$0xff]  }
  0xab   : > { %4448 = vmatprep.subr.bf16.mxu1 %v5080_v26  ;;  %v5124_v26 = vld [vmem:[%s5674_s26 + $0x284] ss:$52 sps:$4 sm:$0xff]  }
  0xac   : > { %2480 = vmatmul.mubr.bf16.gmra.mrb[24].mxu0 %v5028_v12  ;;  %2609 = vmatmul.mubr.bf16.gmra.mrb[24].mxu1 %v5029_v13  ;;  %v5163_v12 = vld [vmem:[#allocation6 + $0x228] sm:$0xff]   ;;  %v5178_v13 = vld [vmem:[#allocation6 + $0x270] sm:$0xff]  }
  0xad   : > { %2487 = vmatprep.mubr.bf16.mxu0 %v5034_v14  ;;  %2616 = vmatprep.mubr.bf16.mxu1 %v5036_v17  ;;  %v5106_v14 = vld [vmem:[%s5674_s26 + $0x4ec] ss:$52 sps:$4 sm:$0xff]   ;;  %v5110_v17 = vld [vmem:[%s5674_s26 + $0x4e8] ss:$52 sps:$4 sm:$0xff]  }
  0xae   : > { %4449 = vmatpush3.bf16.msra.mxu1 %v5081_v29  ;;  %v5127_v29 = vld [vmem:[%s5674_s26 + $0x280] ss:$52 sps:$4 sm:$0xff]  }
  0xaf   : > { %4450 = vmatprep.subr.bf16.mxu1 %v5096_v35  ;;  %v5142_v35 = vld [vmem:[%s5674_s26 + $0x1c] ss:$52 sps:$4 sm:$0xff]  }
  0xb2   : > { %4451 = vmatpush3.bf16.msra.mxu1 %v5097_v36  ;;  %v5140_v36 = vld [vmem:[%s5674_s26 + $0x18] ss:$52 sps:$4 sm:$0xff]  }
  0xb3   : > { %4452 = vmatprep.subr.bf16.mxu1 %v5112_v43  ;;  %v5152_v43 = vld [vmem:[%s5674_s26 + $0x3b8] ss:$52 sps:$4 sm:$0xff]  }
  0xb4   : > { %2488 = vmatmul.mubr.bf16.gmra.mrb[28].mxu0 %v5038_v20  ;;  %2617 = vmatmul.mubr.bf16.gmra.mrb[28].mxu1 %v5039_v21  ;;  %v5118_v20 = vld [vmem:[%s5674_s26 + $0x21c] ss:$52 sps:$4 sm:$0xff]  }
  0xb5   : > { %2495 = vmatprep.mubr.bf16.mxu0 %v5040_v22  ;;  %2624 = vmatprep.mubr.bf16.mxu1 %v5042_v23  ;;  %v5194_v21 = vld [vmem:[#allocation6 + $0x278] sm:$0xff]   ;;  %v5120_v23 = vld [vmem:[%s5674_s26 + $0x550] ss:$52 sps:$4 sm:$0xff]  }
  0xb6   : > { %4453 = vmatpush3.bf16.msra.mxu1 %v5113_v44  ;;  %v5195_v22 = vld [vmem:[#allocation6 + $0x238] sm:$0xff]   ;;  %v5176_v44 = vld [vmem:[#allocation6 + $0x2d0] sm:$0xff]  }
  0xb7   : > { %4454 = vmatprep.subr.bf16.mxu1 %v5128_v49  ;;  %v5192_v49 = vld [vmem:[#allocation6 + $0x2d8] sm:$0xff]  }
  0xba   : > { %4455 = vmatpush3.bf16.msra.mxu1 %v5129_v50  ;;  %v5193_v50 = vld [vmem:[#allocation6 + $0x298] sm:$0xff]  }
  0xbb   : > { %4664 = vmatprep.subr.bf16.mxu1 %v5144_v57  ;;  %v5223_v57 = vld [vmem:[#allocation6 + $0x2e8] sm:$0xff]  }
  0xbc   : > { %2496 = vmatmul.mubr.bf16.gmra.mrb[32].mxu0 %v5044_v27  ;;  %2625 = vmatmul.mubr.bf16.gmra.mrb[32].mxu1 %v5045_v28  ;;  %v5758_v27 = vld [vmem:[#allocation6 + $0x300] sm:$0xff]   ;;  %v5126_v28 = vld [vmem:[%s5674_s26 + $0x5b8] ss:$52 sps:$4 sm:$0xff]  }
  0xbd   : > { %2503 = vmatprep.mubr.bf16.mxu0 %v5050_v31  ;;  %2632 = vmatprep.mubr.bf16.mxu1 %v5052_v32  ;;  %v5134_v31 = vld [vmem:[%s5674_s26 + $0x2ec] ss:$52 sps:$4 sm:$0xff]  }
  0xbe   : > { %v5136_v32 = vld [vmem:[%s5674_s26 + $0x620] ss:$52 sps:$4 sm:$0xff]  }
  0xc4   : > { %2504 = vmatmul.mubr.bf16.gmra.mrb[36].mxu0 %v5054_v33  ;;  %2633 = vmatmul.mubr.bf16.gmra.mrb[36].mxu1 %v5055_v34  ;;  %v5137_v33 = vld [vmem:[%s5674_s26 + $0x2e8] ss:$52 sps:$4 sm:$0xff]  }
  0xc5   : > { %2511 = vmatprep.mubr.bf16.mxu0 %v5058_v37  ;;  %2640 = vmatprep.mubr.bf16.mxu1 %v5060_v38  ;;  %v5138_v34 = vld [vmem:[%s5674_s26 + $0x354] ss:$52 sps:$4 sm:$0xff]   ;;  %v5143_v37 = vld [vmem:[%s5674_s26 + $0x350] ss:$52 sps:$4 sm:$0xff]  }
  0xc6   : > { %v5145_v38 = vld [vmem:[#allocation6 + $0x280] sm:$0xff]  }
  0xcc   : > { %2512 = vmatmul.mubr.bf16.gmra.mrb[40].mxu0 %v5062_v39  ;;  %2641 = vmatmul.mubr.bf16.gmra.mrb[40].mxu1 %v5063_v40  ;;  %v5148_v39 = vld [vmem:[%s5674_s26 + $0x3bc] ss:$52 sps:$4 sm:$0xff]   ;;  %v5150_v40 = vld [vmem:[%s5674_s26 + $0x84] ss:$52 sps:$4 sm:$0xff]  }
  0xcd   : > { %2519 = vmatprep.mubr.bf16.mxu0 %v5066_v41  ;;  %2648 = vmatprep.mubr.bf16.mxu1 %v5068_v42  ;;  %v5160_v41 = vld [vmem:[#allocation6 + $0x2c8] sm:$0xff]  }
  0xce   : > { %v5161_v42 = vld [vmem:[#allocation6 + $0x288] sm:$0xff]  }
  0xd4   : > { %2520 = vmatmul.mubr.bf16.gmra.mrb[44].mxu0 %v5070_v45  ;;  %2649 = vmatmul.mubr.bf16.gmra.mrb[44].mxu1 %v5071_v46  ;;  %v5153_v45 = vld [vmem:[%s5674_s26 + $0x80] ss:$52 sps:$4 sm:$0xff]   ;;  %v5154_v46 = vld [vmem:[%s5674_s26 + $0x424] ss:$52 sps:$4 sm:$0xff]  }
  0xd5   : > { %2656 = vmatprep.mubr.bf16.mxu1 %v5074_v47  ;;  %2753 = vmatprep.mubr.bf16.mxu0 %v5078_v48  ;;  %v5156_v47 = vld [vmem:[%s5674_s26 + $0xec] ss:$52 sps:$4 sm:$0xff]   ;;  %v5177_v48 = vld [vmem:[#allocation6 + $0x290] sm:$0xff]  }
  0xdc   : > { %2657 = vmatmul.mubr.bf16.gmra.mrb[48].mxu1 %v5079_v52  ;;  %2754 = vmatmul.mubr.bf16.vlgmr.msra.gmra.mrb[48].mxu0 %v5076_v51  ;;  %v5208_v51 = vld [vmem:[#allocation6 + $0x2e0] sm:$0xff]  }
  0xdd   : > { %4553 = vmatpush3.bf16.msra.mxu0 %v5083_v53  ;;  %2664 = vmatprep.mubr.bf16.mxu1 %v5084_v54  ;;  %v5158_v52 = vld [vmem:[%s5674_s26 + $0x420] ss:$52 sps:$4 sm:$0xff]   ;;  %v5159_v53 = vld [vmem:[%s5674_s26 + $0xe8] ss:$52 sps:$4 sm:$0xff]  }
  0xde   : > { %2761 = vmatprep.mubr.bf16.mxu0 %v5086_v55  ;;  %4554 = vmatprep.subr.bf16.mxu0 %v5098_v56  ;;  %v5164_v54 = vld [vmem:[%s5674_s26 + $0x48c] ss:$52 sps:$4 sm:$0xff]   ;;  %v5166_v55 = vld [vmem:[%s5674_s26 + $0x154] ss:$52 sps:$4 sm:$0xff]  }
  0xdf   : > { %v5209_v56 = vld [vmem:[#allocation6 + $0x2a0] sm:$0xff]  }
  0xe1   : > { %4555 = vmatpush3.bf16.msra.mxu0 %v5099_v58  ;;  %v5224_v58 = vld [vmem:[#allocation6 + $0x2a8] sm:$0xff]  }
  0xe2   : > { %4556 = vmatprep.subr.bf16.mxu0 %v5114_v59  ;;  %v5238_v59 = vld [vmem:[#allocation6 + $0x2f0] sm:$0xff]  }
  0xe4   : > { %2665 = vmatmul.mubr.bf16.gmra.mrb[52].mxu1 %v5088_v60  ;;  %2762 = vmatmul.mubr.bf16.gmra.mrb[52].mxu0 %v5089_v61  ;;  %v5168_v60 = vld [vmem:[%s5674_s26 + $0x488] ss:$52 sps:$4 sm:$0xff]   ;;  %v5169_v61 = vld [vmem:[%s5674_s26 + $0x150] ss:$52 sps:$4 sm:$0xff]  }
  0xe5   : > { %2672 = vmatprep.mubr.bf16.mxu1 %v5090_v62  ;;  %2769 = vmatprep.mubr.bf16.mxu0 %v5092_v63  ;;  %v5170_v62 = vld [vmem:[%s5674_s26 + $0x4f4] ss:$52 sps:$4 sm:$0xff]   ;;  %v5172_v63 = vld [vmem:[%s5674_s26 + $0x1bc] ss:$52 sps:$4 sm:$0xff]  }
  0xe6   : > { %4557 = vmatpush3.bf16.msra.mxu0 %v5115_v0  ;;  %v5239_v0 = vld [vmem:[#allocation6 + $0x2b0] sm:$0xff]  }
  0xe7   : > { %4558 = vmatprep.subr.bf16.mxu0 %v5130_v1  ;;  %v5253_v1 = vld [vmem:[#allocation6 + $0x2f8] sm:$0xff]  }
  0xea   : > { %4559 = vmatpush3.bf16.msra.mxu0 %v5131_v3  ;;  %v5174_v3 = vld [vmem:[%s5674_s26 + $0x4f0] ss:$52 sps:$4 sm:$0xff]  }
  0xeb   : > { %4560 = vmatprep.subr.bf16.mxu0 %v5146_v4  ;;  %v5175_v4 = vld [vmem:[%s5674_s26 + $0x1b8] ss:$52 sps:$4 sm:$0xff]  }
  0xec   : > { %2673 = vmatmul.mubr.bf16.gmra.mrb[56].mxu1 %v5094_v2  ;;  %2770 = vmatmul.mubr.bf16.gmra.mrb[56].mxu0 %v5095_v5  ;;  %v5254_v2 = vld [vmem:[#allocation6 + $0x2b8] sm:$0xff]  }
  0xed   : > { %2680 = vmatprep.mubr.bf16.mxu1 %v5100_v6  ;;  %2777 = vmatprep.mubr.bf16.mxu0 %v5102_v7  ;;  %v5180_v5 = vld [vmem:[%s5674_s26 + $0x55c] ss:$52 sps:$4 sm:$0xff]   ;;  %v5182_v6 = vld [vmem:[%s5674_s26 + $0x224] ss:$52 sps:$4 sm:$0xff]  }
  0xee   : > { %4561 = vmatpush3.bf16.msra.mxu0 %v5147_v8  ;;  %v5184_v7 = vld [vmem:[%s5674_s26 + $0x558] ss:$52 sps:$4 sm:$0xff]   ;;  %v5185_v8 = vld [vmem:[%s5674_s26 + $0x220] ss:$52 sps:$4 sm:$0xff]  }
  0xef   : > { %4562 = vmatprep.subr.bf16.mxu0 %v5162_v9  ;;  %v5186_v9 = vld [vmem:[%s5674_s26 + $0x5c4] ss:$52 sps:$4 sm:$0xff]  }
  0xf2   : > { %4563 = vmatpush3.bf16.msra.mxu0 %v5163_v12  ;;  %v5191_v12 = vld [vmem:[%s5674_s26 + $0x288] ss:$52 sps:$4 sm:$0xff]  }
  0xf3   : > { %4564 = vmatprep.subr.bf16.mxu0 %v5178_v13  ;;  %v5196_v13 = vld [vmem:[%s5674_s26 + $0x62c] ss:$52 sps:$4 sm:$0xff]  }
  0xf4   : > { %2681 = vmatmul.mubr.bf16.gmra.mrb[60].mxu1 %v5104_v10  ;;  %2778 = vmatmul.mubr.bf16.gmra.mrb[60].mxu0 %v5105_v11  ;;  %v5188_v10 = vld [vmem:[%s5674_s26 + $0x28c] ss:$52 sps:$4 sm:$0xff]  }
  0xf5   : > { %2688 = vmatprep.mubr.bf16.mxu1 %v5106_v14  ;;  %2785 = vmatprep.mubr.bf16.mxu0 %v5108_v15  ;;  %v5190_v11 = vld [vmem:[%s5674_s26 + $0x5c0] ss:$52 sps:$4 sm:$0xff]  }
  0xf6   : > { %4565 = vmatpush3.bf16.msra.mxu0 %v5179_v16  ;;  %v5198_v14 = vld [vmem:[%s5674_s26 + $0x2f4] ss:$52 sps:$4 sm:$0xff]  }
  0xf7   : > { %4566 = vmatprep.subr.bf16.mxu0 %v5194_v21 }
  0xfa   : > { %4567 = vmatpush3.bf16.msra.mxu0 %v5195_v22 }
  0xfb   : > { %4800 = vmatprep.subr.bf16.mxu0 %v5758_v27 }
  0xfc   : > { %2689 = vmatmul.mubr.bf16.gmra.mrb[64].mxu1 %v5110_v17  ;;  %2786 = vmatmul.mubr.bf16.gmra.mrb[64].mxu0 %v5111_v18 }
  0xfd   : > { %2696 = vmatprep.mubr.bf16.mxu1 %v5116_v19  ;;  %2793 = vmatprep.mubr.bf16.mxu0 %v5118_v20  ;;  %v5200_v19 = vld [vmem:[%s5674_s26 + $0x628] ss:$52 sps:$4 sm:$0xff]   ;;  %v5201_v20 = vld [vmem:[%s5674_s26 + $0x2f0] ss:$52 sps:$4 sm:$0xff]  }
 0x104   : > { %2697 = vmatmul.mubr.bf16.gmra.mrb[68].mxu1 %v5120_v23  ;;  %2794 = vmatmul.mubr.bf16.gmra.mrb[68].mxu0 %v5121_v24 }
 0x105   : > { %2704 = vmatprep.mubr.bf16.mxu1 %v5122_v25  ;;  %2801 = vmatprep.mubr.bf16.mxu0 %v5124_v26  ;;  %v5202_v25 = vld [vmem:[%s5674_s26 + $0x35c] ss:$52 sps:$4 sm:$0xff]   ;;  %v5206_v26 = vld [vmem:[%s5674_s26 + $0x24] ss:$52 sps:$4 sm:$0xff]  }
 0x10c   : > { %2705 = vmatmul.mubr.bf16.gmra.mrb[72].mxu1 %v5126_v28  ;;  %2802 = vmatmul.mubr.bf16.gmra.mrb[72].mxu0 %v5127_v29 }
 0x10d   : > { %2712 = vmatprep.mubr.bf16.mxu1 %v5132_v30  ;;  %2809 = vmatprep.mubr.bf16.mxu0 %v5134_v31 }
 0x114   : > { %2713 = vmatmul.mubr.bf16.gmra.mrb[76].mxu1 %v5136_v32  ;;  %2810 = vmatmul.mubr.bf16.gmra.mrb[76].mxu0 %v5137_v33 }
 0x115   : > { %2817 = vmatprep.mubr.bf16.mxu0 %v5138_v34  ;;  %2914 = vmatprep.mubr.bf16.mxu1 %v5142_v35 }
 0x11c   : > { %2818 = vmatmul.mubr.bf16.gmra.mrb[80].mxu0 %v5143_v37  ;;  %2915 = vmatmul.mubr.bf16.vlgmr.msra.gmra.mrb[80].mxu1 %v5140_v36  ;;  %v5204_v36 = vld [vmem:[%s5674_s26 + $0x20] ss:$52 sps:$4 sm:$0xff]   ;;  %v5207_v37 = vld [vmem:[%s5674_s26 + $0x358] ss:$52 sps:$4 sm:$0xff]  }
 0x11d   : > { %4665 = vmatpush3.bf16.msra.mxu1 %v5145_v38  ;;  %2825 = vmatprep.mubr.bf16.mxu0 %v5148_v39 }
 0x11e   : > { %2922 = vmatprep.mubr.bf16.mxu1 %v5150_v40  ;;  %4666 = vmatprep.subr.bf16.mxu1 %v5160_v41 }
 0x121   : > { %4667 = vmatpush3.bf16.msra.mxu1 %v5161_v42  ;;  %v5211_v42 = vld [vmem:[%s5674_s26 + $0x3c4] ss:$52 sps:$4 sm:$0xff]  }
 0x122   : > { %4668 = vmatprep.subr.bf16.mxu1 %v5176_v44 }
 0x124   : > { %2826 = vmatmul.mubr.bf16.gmra.mrb[84].mxu0 %v5152_v43  ;;  %2923 = vmatmul.mubr.bf16.gmra.mrb[84].mxu1 %v5153_v45  ;;  %v5213_v45 = vld [vmem:[%s5674_s26 + $0x8c] ss:$52 sps:$4 sm:$0xff]  }
 0x125   : > { %2833 = vmatprep.mubr.bf16.mxu0 %v5154_v46  ;;  %2930 = vmatprep.mubr.bf16.mxu1 %v5156_v47  ;;  %v5225_v46 = vld [vmem:[#allocation6 + $0x308] sm:$0xff]  }
 0x126   : > { %4669 = vmatpush3.bf16.msra.mxu1 %v5177_v48 }
 0x127   : > { %4670 = vmatprep.subr.bf16.mxu1 %v5192_v49  ;;  %v5240_v49 = vld [vmem:[#allocation6 + $0x310] sm:$0xff]  }
 0x12a   : > { %4671 = vmatpush3.bf16.msra.mxu1 %v5193_v50 }
 0x12b   : > { %4672 = vmatprep.subr.bf16.mxu1 %v5208_v51 }
 0x12c   : > { %2834 = vmatmul.mubr.bf16.gmra.mrb[88].mxu0 %v5158_v52  ;;  %2931 = vmatmul.mubr.bf16.gmra.mrb[88].mxu1 %v5159_v53 }
 0x12d   : > { %2841 = vmatprep.mubr.bf16.mxu0 %v5164_v54  ;;  %2938 = vmatprep.mubr.bf16.mxu1 %v5166_v55  ;;  %v5215_v54 = vld [vmem:[%s5674_s26 + $0x3c0] ss:$52 sps:$4 sm:$0xff]   ;;  %v5216_v55 = vld [vmem:[%s5674_s26 + $0x88] ss:$52 sps:$4 sm:$0xff]  }
 0x12e   : > { %4673 = vmatpush3.bf16.msra.mxu1 %v5209_v56 }
 0x12f   : > { %4674 = vmatprep.subr.bf16.mxu1 %v5223_v57 }
 0x132   : > { %4675 = vmatpush3.bf16.msra.mxu1 %v5224_v58 }
 0x133   : > { %4676 = vmatprep.subr.bf16.mxu1 %v5238_v59 }
 0x134   : > { %2842 = vmatmul.mubr.bf16.gmra.mrb[92].mxu0 %v5168_v60  ;;  %2939 = vmatmul.mubr.bf16.gmra.mrb[92].mxu1 %v5169_v61  ;;  %v5217_v60 = vld [vmem:[%s5674_s26 + $0x42c] ss:$52 sps:$4 sm:$0xff]   ;;  %v5219_v61 = vld [vmem:[%s5674_s26 + $0xf4] ss:$52 sps:$4 sm:$0xff]  }
 0x135   : > { %2849 = vmatprep.mubr.bf16.mxu0 %v5170_v62  ;;  %2946 = vmatprep.mubr.bf16.mxu1 %v5172_v63 }
 0x136   : > { %4677 = vmatpush3.bf16.msra.mxu1 %v5239_v0 }
 0x137   : > { %4678 = vmatprep.subr.bf16.mxu1 %v5253_v1  ;;  %v5255_v1 = vld [vmem:[#allocation6 + $0x318] sm:$0xff]  }
 0x13a   : > { %4679 = vmatpush3.bf16.msra.mxu1 %v5254_v2 }
 0x13c   : > { %2850 = vmatmul.mubr.bf16.gmra.mrb[96].mxu0 %v5174_v3  ;;  %2947 = vmatmul.mubr.bf16.gmra.mrb[96].mxu1 %v5175_v4  ;;  %v5268_v4 = vld [vmem:[#allocation6 + $0x320] sm:$0xff]  }
 0x13d   : > { %2857 = vmatprep.mubr.bf16.mxu0 %v5180_v5  ;;  %2954 = vmatprep.mubr.bf16.mxu1 %v5182_v6 }
 0x144   : > { %2858 = vmatmul.mubr.bf16.gmra.mrb[100].mxu0 %v5184_v7  ;;  %2955 = vmatmul.mubr.bf16.gmra.mrb[100].mxu1 %v5185_v8  ;;  %v5221_v7 = vld [vmem:[%s5674_s26 + $0x428] ss:$52 sps:$4 sm:$0xff]   ;;  %v5222_v8 = vld [vmem:[%s5674_s26 + $0xf0] ss:$52 sps:$4 sm:$0xff]  }
 0x145   : > { %2865 = vmatprep.mubr.bf16.mxu0 %v5186_v9  ;;  %2962 = vmatprep.mubr.bf16.mxu1 %v5188_v10 }
 0x14c   : > { %2866 = vmatmul.mubr.bf16.gmra.mrb[104].mxu0 %v5190_v11  ;;  %2963 = vmatmul.mubr.bf16.gmra.mrb[104].mxu1 %v5191_v12 }
 0x14d   : > { %2873 = vmatprep.mubr.bf16.mxu0 %v5196_v13  ;;  %2970 = vmatprep.mubr.bf16.mxu1 %v5198_v14  ;;  %v5226_v13 = vld [vmem:[%s5674_s26 + $0x494] ss:$52 sps:$4 sm:$0xff]   ;;  %v5228_v14 = vld [vmem:[%s5674_s26 + $0x15c] ss:$52 sps:$4 sm:$0xff]  }
 0x14f   : > { %v4192_v15 = vpop.f32.mrb[0].mxu1  ;;  %v4120_v16 = vpop.f32.mrb[0].mxu0 }
 0x150   : > { %v4193_v17 = vpop.f32.mrb[1].mxu1  ;;  %v4121_v18 = vpop.f32.mrb[1].mxu0 }
 0x151   : > { %v5799_v21 = vadd.f32 %v4193_v17, %v4192_v15  ;;  %v4195_v22 = vpop.f32.mrb[2].mxu1  ;;  %v5801_v23 = vadd.f32 %v4121_v18, %v4120_v16  ;;  %v4123_v24 = vpop.f32.mrb[2].mxu0 }
 0x152   : > { %v4196_v28 = vpop.f32.mrb[3].mxu1  ;;  %v4124_v29 = vpop.f32.mrb[3].mxu0 }
 0x153   : > { %v5805_v30 = vadd.f32 %v4196_v28, %v4195_v22  ;;  %v5807_v31 = vadd.f32 %v4124_v29, %v4123_v24  ;;  %v5294_v24 = vld [vmem:[#allocation6 + $0x330] sm:$0xff]   ;;  %v5231_v29 = vld [vmem:[%s5674_s26 + $0x158] ss:$52 sps:$4 sm:$0xff]  }
 0x154   : > { %2874 = vmatmul.mubr.bf16.gmra.mrb[108].mxu0 %v5200_v19  ;;  %2971 = vmatmul.mubr.bf16.gmra.mrb[108].mxu1 %v5201_v20  ;;  %v5281_v19 = vld [vmem:[#allocation6 + $0x328] sm:$0xff]   ;;  %v5230_v28 = vld [vmem:[%s5674_s26 + $0x490] ss:$52 sps:$4 sm:$0xff]  }
 0x155   : > { %2978 = vmatprep.mubr.bf16.mxu1 %v5202_v25  ;;  %3075 = vmatprep.mubr.bf16.mxu0 %v5206_v26 }
 0x157   : > { %v4198_v32 = vpop.f32.mrb[4].mxu1  ;;  %v4126_v33 = vpop.f32.mrb[4].mxu0 }
 0x158   : > { %v4199_v34 = vpop.f32.mrb[5].mxu1  ;;  %v4127_v35 = vpop.f32.mrb[5].mxu0 }
 0x159   : > { %v5811_v38 = vadd.f32 %v4199_v34, %v4198_v32  ;;  %v4201_v39 = vpop.f32.mrb[6].mxu1  ;;  %v5813_v40 = vadd.f32 %v4127_v35, %v4126_v33  ;;  %v4129_v41 = vpop.f32.mrb[6].mxu0 }
 0x15a   : > { %v4202_v43 = vpop.f32.mrb[7].mxu1  ;;  %v4130_v44 = vpop.f32.mrb[7].mxu0 }
 0x15b   : > { %v5817_v47 = vadd.f32 %v4202_v43, %v4201_v39  ;;  %v5819_v48 = vadd.f32 %v4130_v44, %v4129_v41 }
 0x15c   : > { %2979 = vmatmul.mubr.bf16.gmra.mrb[112].mxu1 %v5207_v37  ;;  %3076 = vmatmul.mubr.bf16.vlgmr.msra.gmra.mrb[112].mxu0 %v5204_v36  ;;  %v5232_v36 = vld [vmem:[%s5674_s26 + $0x4fc] ss:$52 sps:$4 sm:$0xff]   ;;  %v5234_v37 = vld [vmem:[%s5674_s26 + $0x1c4] ss:$52 sps:$4 sm:$0xff]  }
 0x15d   : > { %4801 = vmatpush3.bf16.msra.mxu0 %v5758_v27  ;;  %2986 = vmatprep.mubr.bf16.mxu1 %v5211_v42 }
 0x15e   : > { %3083 = vmatprep.mubr.bf16.mxu0 %v5213_v45  ;;  %4802 = vmatprep.subr.bf16.mxu0 %v5225_v46  ;;  %v5307_v45 = vld [vmem:[#allocation6 + $0x338] sm:$0xff]  }
 0x15f   : > { %v4204_v50 = vpop.f32.mrb[8].mxu1  ;;  %v4132_v51 = vpop.f32.mrb[8].mxu0 }
 0x160   : > { %v4205_v52 = vpop.f32.mrb[9].mxu1  ;;  %v4133_v53 = vpop.f32.mrb[9].mxu0 }
 0x161   : > { %v5824_v56 = vadd.f32 %v4205_v52, %v4204_v50  ;;  %v4207_v57 = vpop.f32.mrb[10].mxu1  ;;  %v5826_v58 = vadd.f32 %v4133_v53, %v4132_v51  ;;  %v4135_v59 = vpop.f32.mrb[10].mxu0  ;;  %4803 = vmatpush3.bf16.msra.mxu0 %v5225_v46  ;;  %v5236_v52 = vld [vmem:[%s5674_s26 + $0x4f8] ss:$52 sps:$4 sm:$0xff]   ;;  %v5237_v53 = vld [vmem:[%s5674_s26 + $0x1c0] ss:$52 sps:$4 sm:$0xff]  }
 0x162   : > { %v4208_v27 = vpop.f32.mrb[11].mxu1  ;;  %v4136_v62 = vpop.f32.mrb[11].mxu0  ;;  %4804 = vmatprep.subr.bf16.mxu0 %v5240_v49 }
 0x163   : > { %v5830_v63 = vadd.f32 %v4208_v27, %v4207_v57  ;;  %v5832_v0 = vadd.f32 %v4136_v62, %v4135_v59 }
 0x164   : > { %2987 = vmatmul.mubr.bf16.gmra.mrb[116].mxu1 %v5215_v54  ;;  %3084 = vmatmul.mubr.bf16.gmra.mrb[116].mxu0 %v5216_v55 }
 0x165   : > { %2994 = vmatprep.mubr.bf16.mxu1 %v5217_v60  ;;  %3091 = vmatprep.mubr.bf16.mxu0 %v5219_v61  ;;  %v5241_v60 = vld [vmem:[%s5674_s26 + $0x564] ss:$52 sps:$4 sm:$0xff]   ;;  %v5243_v61 = vld [vmem:[%s5674_s26 + $0x22c] ss:$52 sps:$4 sm:$0xff]  }
 0x166   : > { %4805 = vmatpush3.bf16.msra.mxu0 %v5240_v49 }
 0x167   : > { %v4210_v2 = vpop.f32.mrb[12].mxu1  ;;  %v4138_v3 = vpop.f32.mrb[12].mxu0  ;;  %4806 = vmatprep.subr.bf16.mxu0 %v5255_v1 }
 0x168   : > { %v4211_v5 = vpop.f32.mrb[13].mxu1  ;;  %v4139_v6 = vpop.f32.mrb[13].mxu0 }
 0x169   : > { %v5836_v9 = vadd.f32 %v4211_v5, %v4210_v2  ;;  %v4213_v10 = vpop.f32.mrb[14].mxu1  ;;  %v5838_v11 = vadd.f32 %v4139_v6, %v4138_v3  ;;  %v4141_v12 = vpop.f32.mrb[14].mxu0 }
 0x16a   : > { %v4214_v15 = vpop.f32.mrb[15].mxu1  ;;  %v4142_v16 = vpop.f32.mrb[15].mxu0  ;;  %4807 = vmatpush3.bf16.msra.mxu0 %v5255_v1 }
 0x16b   : > { %v5842_v17 = vadd.f32 %v4214_v15, %v4213_v10  ;;  %v5844_v18 = vadd.f32 %v4142_v16, %v4141_v12  ;;  %4808 = vmatprep.subr.bf16.mxu0 %v5268_v4  ;;  %v5246_v10 = vld [vmem:[%s5674_s26 + $0x228] ss:$52 sps:$4 sm:$0xff]   ;;  %v5247_v15 = vld [vmem:[%s5674_s26 + $0x5cc] ss:$52 sps:$4 sm:$0xff]  }
 0x16c   : > { %2995 = vmatmul.mubr.bf16.gmra.mrb[120].mxu1 %v5221_v7  ;;  %3092 = vmatmul.mubr.bf16.gmra.mrb[120].mxu0 %v5222_v8  ;;  %v5245_v8 = vld [vmem:[%s5674_s26 + $0x560] ss:$52 sps:$4 sm:$0xff]  }
 0x16d   : > { %3002 = vmatprep.mubr.bf16.mxu1 %v5226_v13  ;;  %3099 = vmatprep.mubr.bf16.mxu0 %v5228_v14  ;;  %v5249_v16 = vld [vmem:[%s5674_s26 + $0x294] ss:$52 sps:$4 sm:$0xff]  }
 0x16e   : > { %4809 = vmatpush3.bf16.msra.mxu0 %v5268_v4 }
 0x16f   : > { %v4232_v20 = vpop.f32.mrb[16].mxu1  ;;  %v4144_v22 = vpop.f32.mrb[16].mxu0  ;;  %4810 = vmatprep.subr.bf16.mxu0 %v5281_v19 }
 0x170   : > { %v4233_v25 = vpop.f32.mrb[17].mxu1  ;;  %v4145_v26 = vpop.f32.mrb[17].mxu0 }
 0x171   : > { %v4234_v32 = vadd.f32 %v4233_v25, %v4232_v20  ;;  %v4235_v33 = vpop.f32.mrb[18].mxu1  ;;  %v5848_v34 = vadd.f32 %v4145_v26, %v4144_v22  ;;  %v4147_v35 = vpop.f32.mrb[18].mxu0 }
 0x172   : > { %v4236_v39 = vpop.f32.mrb[19].mxu1  ;;  %v4148_v41 = vpop.f32.mrb[19].mxu0  ;;  %4811 = vmatpush3.bf16.msra.mxu0 %v5281_v19 }
 0x173   : > { %v5853_v42 = vadd.f32 %v4234_v32, %v5801_v23  ;;  %v4237_v43 = vadd.f32 %v4236_v39, %v4235_v33  ;;  %v5855_v44 = vadd.f32 %v4148_v41, %v4147_v35  ;;  %4812 = vmatprep.subr.bf16.mxu0 %v5294_v24  ;;  %v5251_v33 = vld [vmem:[%s5674_s26 + $0x5c8] ss:$52 sps:$4 sm:$0xff]   ;;  %v5252_v35 = vld [vmem:[%s5674_s26 + $0x290] ss:$52 sps:$4 sm:$0xff]  }
 0x174   : > { %3003 = vmatmul.mubr.bf16.gmra.mrb[124].mxu1 %v5230_v28  ;;  %3100 = vmatmul.mubr.bf16.gmra.mrb[124].mxu0 %v5231_v29  ;;  %v5256_v41 = vld [vmem:[%s5674_s26 + $0x634] ss:$52 sps:$4 sm:$0xff]  }
 0x175   : > { %v5858_v46 = vadd.f32 %v4237_v43, %v5807_v31  ;;  %3010 = vmatprep.mubr.bf16.mxu1 %v5232_v36  ;;  %3107 = vmatprep.mubr.bf16.mxu0 %v5234_v37  ;;  %v5258_v43 = vld [vmem:[%s5674_s26 + $0x2fc] ss:$52 sps:$4 sm:$0xff]  }
 0x176   : > { %4813 = vmatpush3.bf16.msra.mxu0 %v5294_v24 }
 0x177   : > { %v4238_v49 = vpop.f32.mrb[20].mxu1  ;;  %v4150_v23 = vpop.f32.mrb[20].mxu0  ;;  %4814 = vmatprep.subr.bf16.mxu0 %v5307_v45 }
 0x178   : > { %v4239_v50 = vpop.f32.mrb[21].mxu1  ;;  %v4151_v51 = vpop.f32.mrb[21].mxu0 }
 0x179   : > { %v4240_v54 = vadd.f32 %v4239_v50, %v4238_v49  ;;  %v4241_v55 = vpop.f32.mrb[22].mxu1  ;;  %v5862_v57 = vadd.f32 %v4151_v51, %v4150_v23  ;;  %v4153_v59 = vpop.f32.mrb[22].mxu0 }
 0x17a   : > { %v4242_v31 = vpop.f32.mrb[23].mxu1  ;;  %v4154_v27 = vpop.f32.mrb[23].mxu0  ;;  %4815 = vmatpush3.bf16.msra.mxu0 %v5307_v45 }
 0x17b   : > { %v5867_v62 = vadd.f32 %v4240_v54, %v5813_v40  ;;  %v4243_v1 = vadd.f32 %v4242_v31, %v4241_v55  ;;  %v5869_v2 = vadd.f32 %v4154_v27, %v4153_v59  ;;  %v5260_v59 = vld [vmem:[%s5674_s26 + $0x630] ss:$52 sps:$4 sm:$0xff]  }
 0x17c   : > { %3011 = vmatmul.mubr.bf16.gmra.mrb[128].mxu1 %v5236_v52  ;;  %3108 = vmatmul.mubr.bf16.gmra.mrb[128].mxu0 %v5237_v53 }
 0x17d   : > { %v5872_v3 = vadd.f32 %v4243_v1, %v5819_v48  ;;  %3018 = vmatprep.mubr.bf16.mxu1 %v5241_v60  ;;  %3115 = vmatprep.mubr.bf16.mxu0 %v5243_v61  ;;  %v5261_v60 = vld [vmem:[%s5674_s26 + $0x2f8] ss:$52 sps:$4 sm:$0xff]  }
 0x17e   : > { %v5262_v1 = vld [vmem:[%s5674_s26 + $0x364] ss:$52 sps:$4 sm:$0xff]  }
 0x17f   : > { %v4244_v4 = vpop.f32.mrb[24].mxu1  ;;  %v4156_v5 = vpop.f32.mrb[24].mxu0 }
 0x180   : > { %v4245_v6 = vpop.f32.mrb[25].mxu1  ;;  %v4157_v7 = vpop.f32.mrb[25].mxu0 }
 0x181   : > { %v4246_v40 = vadd.f32 %v4245_v6, %v4244_v4  ;;  %v4247_v12 = vpop.f32.mrb[26].mxu1  ;;  %v5876_v13 = vadd.f32 %v4157_v7, %v4156_v5  ;;  %v4159_v14 = vpop.f32.mrb[26].mxu0  ;;  %v5266_v4 = vld [vmem:[%s5674_s26 + $0x2c] ss:$52 sps:$4 sm:$0xff]  }
 0x182   : > { %v4248_v19 = vpop.f32.mrb[27].mxu1  ;;  %v4160_v48 = vpop.f32.mrb[27].mxu0 }
 0x183   : > { %v5881_v20 = vadd.f32 %v4246_v40, %v5826_v58  ;;  %v4249_v22 = vadd.f32 %v4248_v19, %v4247_v12  ;;  %v5883_v24 = vadd.f32 %v4160_v48, %v4159_v14  ;;  %v5267_v19 = vld [vmem:[%s5674_s26 + $0x360] ss:$52 sps:$4 sm:$0xff]  }
 0x184   : > { %3019 = vmatmul.mubr.bf16.gmra.mrb[132].mxu1 %v5245_v8  ;;  %3116 = vmatmul.mubr.bf16.gmra.mrb[132].mxu0 %v5246_v10 }
 0x185   : > { %v5886_v25 = vadd.f32 %v4249_v22, %v5832_v0  ;;  %3026 = vmatprep.mubr.bf16.mxu1 %v5247_v15  ;;  %3123 = vmatprep.mubr.bf16.mxu0 %v5249_v16  ;;  %v5264_v16 = vld [vmem:[%s5674_s26 + $0x28] ss:$52 sps:$4 sm:$0xff]  }
 0x187   : > { %v4250_v26 = vpop.f32.mrb[28].mxu1  ;;  %v4162_v28 = vpop.f32.mrb[28].mxu0 }
 0x188   : > { %v4251_v29 = vpop.f32.mrb[29].mxu1  ;;  %v4163_v32 = vpop.f32.mrb[29].mxu0 }
 0x189   : > { %v4252_v58 = vadd.f32 %v4251_v29, %v4250_v26  ;;  %v4253_v36 = vpop.f32.mrb[30].mxu1  ;;  %v5890_v37 = vadd.f32 %v4163_v32, %v4162_v28  ;;  %v4165_v39 = vpop.f32.mrb[30].mxu0  ;;  %v5269_v28 = vld [vmem:[%s5674_s26 + $0x3cc] ss:$52 sps:$4 sm:$0xff]   ;;  %v5271_v29 = vld [vmem:[%s5674_s26 + $0x94] ss:$52 sps:$4 sm:$0xff]  }
 0x18a   : > { %v4254_v45 = vpop.f32.mrb[31].mxu1  ;;  %v4166_v0 = vpop.f32.mrb[31].mxu0 }
 0x18b   : > { %v5895_v49 = vadd.f32 %v4252_v58, %v5838_v11  ;;  %v4255_v23 = vadd.f32 %v4254_v45, %v4253_v36  ;;  %v5897_v50 = vadd.f32 %v4166_v0, %v4165_v39  ;;  %v5273_v0 = vld [vmem:[%s5674_s26 + $0x3c8] ss:$52 sps:$4 sm:$0xff]  }
 0x18c   : > { %3027 = vmatmul.mubr.bf16.gmra.mrb[136].mxu1 %v5251_v33  ;;  %3124 = vmatmul.mubr.bf16.gmra.mrb[136].mxu0 %v5252_v35 }
 0x18d   : > { %v5900_v51 = vadd.f32 %v4255_v23, %v5844_v18  ;;  %3034 = vmatprep.mubr.bf16.mxu1 %v5256_v41  ;;  %3131 = vmatprep.mubr.bf16.mxu0 %v5258_v43  ;;  %v5274_v23 = vld [vmem:[%s5674_s26 + $0x90] ss:$52 sps:$4 sm:$0xff]  }
 0x18f   : > { %v4256_v52 = vpop.f32.mrb[32].mxu1  ;;  %v4168_v53 = vpop.f32.mrb[32].mxu0 }
 0x190   : > { %v4257_v54 = vpop.f32.mrb[33].mxu1  ;;  %v4169_v55 = vpop.f32.mrb[33].mxu0 }
 0x191   : > { %v4258_v11 = vadd.f32 %v4257_v54, %v4256_v52  ;;  %v4259_v61 = vpop.f32.mrb[34].mxu1  ;;  %v5904_v31 = vadd.f32 %v4169_v55, %v4168_v53  ;;  %v4171_v27 = vpop.f32.mrb[34].mxu0  ;;  %v5275_v55 = vld [vmem:[%s5674_s26 + $0x434] ss:$52 sps:$4 sm:$0xff]  }
 0x192   : > { %v4260_v5 = vpop.f32.mrb[35].mxu1  ;;  %v4172_v18 = vpop.f32.mrb[35].mxu0 }
 0x193   : > { %v5909_v6 = vadd.f32 %v4258_v11, %v5848_v34  ;;  %v4261_v7 = vadd.f32 %v4260_v5, %v4259_v61  ;;  %v5911_v8 = vadd.f32 %v4172_v18, %v4171_v27 }
 0x194   : > { %3035 = vmatmul.mubr.bf16.gmra.mrb[140].mxu1 %v5260_v59  ;;  %3132 = vmatmul.mubr.bf16.gmra.mrb[140].mxu0 %v5261_v60  ;;  %v5277_v59 = vld [vmem:[%s5674_s26 + $0xfc] ss:$52 sps:$4 sm:$0xff]  }
 0x195   : > { %v5914_v10 = vadd.f32 %v4261_v7, %v5855_v44  ;;  %3139 = vmatprep.mubr.bf16.mxu0 %v5262_v1  ;;  %3236 = vmatprep.mubr.bf16.mxu1 %v5266_v4 }
 0x197   : > { %v4262_v40 = vpop.f32.mrb[36].mxu1  ;;  %v4174_v12 = vpop.f32.mrb[36].mxu0 }
 0x198   : > { %v4263_v14 = vpop.f32.mrb[37].mxu1  ;;  %v4175_v15 = vpop.f32.mrb[37].mxu0 }
 0x199   : > { %v4264_v34 = vadd.f32 %v4263_v14, %v4262_v40  ;;  %v4265_v48 = vpop.f32.mrb[38].mxu1  ;;  %v5918_v22 = vadd.f32 %v4175_v15, %v4174_v12  ;;  %v4177_v26 = vpop.f32.mrb[38].mxu0  ;;  %v5279_v40 = vld [vmem:[%s5674_s26 + $0x430] ss:$52 sps:$4 sm:$0xff]   ;;  %v5280_v12 = vld [vmem:[%s5674_s26 + $0xf8] ss:$52 sps:$4 sm:$0xff]  }
 0x19a   : > { %v4266_v32 = vpop.f32.mrb[39].mxu1  ;;  %v4178_v44 = vpop.f32.mrb[39].mxu0 }
 0x19b   : > { %v5923_v33 = vadd.f32 %v4264_v34, %v5862_v57  ;;  %v4267_v35 = vadd.f32 %v4266_v32, %v4265_v48  ;;  %v5925_v58 = vadd.f32 %v4178_v44, %v4177_v26  ;;  %v5284_v34 = vld [vmem:[%s5674_s26 + $0x164] ss:$52 sps:$4 sm:$0xff]  }
 0x19c   : > { %3140 = vmatmul.mubr.bf16.gmra.mrb[144].mxu0 %v5267_v19  ;;  %3237 = vmatmul.mubr.bf16.vlgmr.msra.gmra.mrb[144].mxu1 %v5264_v16  ;;  %v5282_v19 = vld [vmem:[%s5674_s26 + $0x49c] ss:$52 sps:$4 sm:$0xff]  }
 0x19d   : > { %v5928_v36 = vadd.f32 %v4267_v35, %v5869_v2  ;;  %3147 = vmatprep.mubr.bf16.mxu0 %v5269_v28  ;;  %3244 = vmatprep.mubr.bf16.mxu1 %v5271_v29 }
 0x19f   : > { %v4268_v39 = vpop.f32.mrb[40].mxu1  ;;  %v4180_v41 = vpop.f32.mrb[40].mxu0 }
 0x1a0   : > { %v4269_v43 = vpop.f32.mrb[41].mxu1  ;;  %v4181_v45 = vpop.f32.mrb[41].mxu0 }
 0x1a1   : > { %v4270_v57 = vadd.f32 %v4269_v43, %v4268_v39  ;;  %v4271_v52 = vpop.f32.mrb[42].mxu1  ;;  %v5932_v53 = vadd.f32 %v4181_v45, %v4180_v41  ;;  %v4183_v54 = vpop.f32.mrb[42].mxu0  ;;  %v5286_v43 = vld [vmem:[%s5674_s26 + $0x498] ss:$52 sps:$4 sm:$0xff]   ;;  %v5287_v45 = vld [vmem:[%s5674_s26 + $0x160] ss:$52 sps:$4 sm:$0xff]  }
 0x1a2   : > { %v4272_v60 = vpop.f32.mrb[43].mxu1  ;;  %v4184_v2 = vpop.f32.mrb[43].mxu0 }
 0x1a3   : > { %v5937_v11 = vadd.f32 %v4270_v57, %v5876_v13  ;;  %v4273_v61 = vadd.f32 %v4272_v60, %v4271_v52  ;;  %v5939_v27 = vadd.f32 %v4184_v2, %v4183_v54  ;;  %v5288_v52 = vld [vmem:[%s5674_s26 + $0x504] ss:$52 sps:$4 sm:$0xff]   ;;  %v5290_v54 = vld [vmem:[%s5674_s26 + $0x1cc] ss:$52 sps:$4 sm:$0xff]  }
 0x1a4   : > { %3148 = vmatmul.mubr.bf16.gmra.mrb[148].mxu0 %v5273_v0  ;;  %3245 = vmatmul.mubr.bf16.gmra.mrb[148].mxu1 %v5274_v23 }
 0x1a5   : > { %v5942_v1 = vadd.f32 %v4273_v61, %v5883_v24  ;;  %3155 = vmatprep.mubr.bf16.mxu0 %v5275_v55  ;;  %3252 = vmatprep.mubr.bf16.mxu1 %v5277_v59 }
 0x1a7   : > { %v4274_v4 = vpop.f32.mrb[44].mxu1  ;;  %v4186_v5 = vpop.f32.mrb[44].mxu0 }
 0x1a8   : > { %v4275_v18 = vpop.f32.mrb[45].mxu1  ;;  %v4187_v7 = vpop.f32.mrb[45].mxu0 }
 0x1a9   : > { %v4276_v13 = vadd.f32 %v4275_v18, %v4274_v4  ;;  %v4277_v14 = vpop.f32.mrb[46].mxu1  ;;  %v5946_v15 = vadd.f32 %v4187_v7, %v4186_v5  ;;  %v4189_v16 = vpop.f32.mrb[46].mxu0 }
 0x1aa   : > { %v4278_v48 = vpop.f32.mrb[47].mxu1  ;;  %v4190_v24 = vpop.f32.mrb[47].mxu0 }
 0x1ab   : > { %v5951_v26 = vadd.f32 %v4276_v13, %v5890_v37  ;;  %v4279_v28 = vadd.f32 %v4278_v48, %v4277_v14  ;;  %v5953_v29 = vadd.f32 %v4190_v24, %v4189_v16  ;;  %v5297_v48 = vld [vmem:[%s5674_s26 + $0x234] ss:$52 sps:$4 sm:$0xff]  }
 0x1ac   : > { %3156 = vmatmul.mubr.bf16.gmra.mrb[152].mxu0 %v5279_v40  ;;  %3253 = vmatmul.mubr.bf16.gmra.mrb[152].mxu1 %v5280_v12  ;;  %v5293_v12 = vld [vmem:[%s5674_s26 + $0x1c8] ss:$52 sps:$4 sm:$0xff]  }
 0x1ad   : > { %v5956_v32 = vadd.f32 %v4279_v28, %v5897_v50  ;;  %3163 = vmatprep.mubr.bf16.mxu0 %v5282_v19  ;;  %3260 = vmatprep.mubr.bf16.mxu1 %v5284_v34  ;;  %v5295_v34 = vld [vmem:[%s5674_s26 + $0x56c] ss:$52 sps:$4 sm:$0xff]  }
 0x1af   : > { %v4280_v44 = vpop.f32.mrb[48].mxu1  ;;  %v4344_v35 = vpop.f32.mrb[48].mxu0 }
 0x1b0   : > { %v4281_v39 = vpop.f32.mrb[49].mxu1  ;;  %v4345_v41 = vpop.f32.mrb[49].mxu0 }
 0x1b1   : > { %v4282_v37 = vadd.f32 %v4281_v39, %v4280_v44  ;;  %v4346_v0 = vadd.f32 %v4345_v41, %v4344_v35  ;;  %v4283_v23 = vpop.f32.mrb[50].mxu1  ;;  %v4347_v57 = vpop.f32.mrb[50].mxu0 }
 0x1b2   : > { %v4284_v55 = vpop.f32.mrb[51].mxu1  ;;  %v4348_v59 = vpop.f32.mrb[51].mxu0 }
 0x1b3   : > { %v5963_v50 = vadd.f32 %v4282_v37, %v5904_v31  ;;  %v5966_v60 = vadd.f32 %v4346_v0, %v5853_v42  ;;  %v4285_v2 = vadd.f32 %v4284_v55, %v4283_v23  ;;  %v4349_v61 = vadd.f32 %v4348_v59, %v4347_v57  ;;  %v5292_v42 = vld [vmem:[%s5674_s26 + $0x500] ss:$52 sps:$4 sm:$0xff]   ;;  %v5300_v0 = vld [vmem:[%s5674_s26 + $0x230] ss:$52 sps:$4 sm:$0xff]  }
 0x1b4   : > { %3164 = vmatmul.mubr.bf16.gmra.mrb[156].mxu0 %v5286_v43  ;;  %3261 = vmatmul.mubr.bf16.gmra.mrb[156].mxu1 %v5287_v45  ;;  %v5301_v55 = vld [vmem:[%s5674_s26 + $0x5d4] ss:$52 sps:$4 sm:$0xff]   ;;  %v5303_v59 = vld [vmem:[%s5674_s26 + $0x29c] ss:$52 sps:$4 sm:$0xff]  }
 0x1b5   : > { %v5969_v4 = vadd.f32 %v4285_v2, %v5911_v8  ;;  %v5972_v5 = vadd.f32 %v4349_v61, %v5858_v46  ;;  %3171 = vmatprep.mubr.bf16.mxu0 %v5288_v52  ;;  %3268 = vmatprep.mubr.bf16.mxu1 %v5290_v54 }
 0x1b7   : > { %v4286_v18 = vpop.f32.mrb[52].mxu1  ;;  %v4350_v31 = vpop.f32.mrb[52].mxu0 }
 0x1b8   : > { %v4287_v7 = vpop.f32.mrb[53].mxu1  ;;  %v4351_v40 = vpop.f32.mrb[53].mxu0 }
 0x1b9   : > { %v4288_v13 = vadd.f32 %v4287_v7, %v4286_v18  ;;  %v4352_v14 = vadd.f32 %v4351_v40, %v4350_v31  ;;  %v4289_v16 = vpop.f32.mrb[54].mxu1  ;;  %v4353_v19 = vpop.f32.mrb[54].mxu0 }
 0x1ba   : > { %v4290_v24 = vpop.f32.mrb[55].mxu1  ;;  %v4354_v8 = vpop.f32.mrb[55].mxu0 }
 0x1bb   : > { %v5979_v46 = vadd.f32 %v4288_v13, %v5918_v22  ;;  %v5982_v28 = vadd.f32 %v4352_v14, %v5867_v62  ;;  %v4291_v44 = vadd.f32 %v4290_v24, %v4289_v16  ;;  %v4355_v35 = vadd.f32 %v4354_v8, %v4353_v19  ;;  %v5299_v62 = vld [vmem:[%s5674_s26 + $0x568] ss:$52 sps:$4 sm:$0xff]   ;;  %v5306_v14 = vld [vmem:[%s5674_s26 + $0x298] ss:$52 sps:$4 sm:$0xff]  }
 0x1bc   : > { %3172 = vmatmul.mubr.bf16.gmra.mrb[160].mxu0 %v5292_v42  ;;  %3269 = vmatmul.mubr.bf16.gmra.mrb[160].mxu1 %v5293_v12  ;;  %v5308_v24 = vld [vmem:[%s5674_s26 + $0x63c] ss:$52 sps:$4 sm:$0xff]   ;;  %v5310_v8 = vld [vmem:[%s5674_s26 + $0x304] ss:$52 sps:$4 sm:$0xff]  }
 0x1bd   : > { %v5985_v39 = vadd.f32 %v4291_v44, %v5925_v58  ;;  %v5988_v41 = vadd.f32 %v4355_v35, %v5872_v3  ;;  %3179 = vmatprep.mubr.bf16.mxu0 %v5295_v34  ;;  %3276 = vmatprep.mubr.bf16.mxu1 %v5297_v48 }
 0x1bf   : > { %v4292_v43 = vpop.f32.mrb[56].mxu1  ;;  %v4356_v22 = vpop.f32.mrb[56].mxu0 }
 0x1c0   : > { %v4293_v45 = vpop.f32.mrb[57].mxu1  ;;  %v4357_v37 = vpop.f32.mrb[57].mxu0 }
 0x1c1   : > { %v4294_v23 = vadd.f32 %v4293_v45, %v4292_v43  ;;  %v4358_v57 = vadd.f32 %v4357_v37, %v4356_v22  ;;  %v4295_v52 = vpop.f32.mrb[58].mxu1  ;;  %v4359_v54 = vpop.f32.mrb[58].mxu0 }
 0x1c2   : > { %v4296_v2 = vpop.f32.mrb[59].mxu1  ;;  %v4360_v58 = vpop.f32.mrb[59].mxu0 }
 0x1c3   : > { %v5995_v3 = vadd.f32 %v4294_v23, %v5932_v53  ;;  %v5998_v61 = vadd.f32 %v4358_v57, %v5881_v20  ;;  %v4297_v18 = vadd.f32 %v4296_v2, %v4295_v52  ;;  %v4361_v31 = vadd.f32 %v4360_v58, %v4359_v54  ;;  %v5305_v20 = vld [vmem:[%s5674_s26 + $0x5d0] ss:$52 sps:$4 sm:$0xff]   ;;  %v5313_v57 = vld [vmem:[%s5674_s26 + $0x300] ss:$52 sps:$4 sm:$0xff]  }
 0x1c4   : > { %3180 = vmatmul.mubr.bf16.gmra.mrb[164].mxu0 %v5299_v62  ;;  %3277 = vmatmul.mubr.bf16.gmra.mrb[164].mxu1 %v5300_v0  ;;  %v5314_v2 = vld [vmem:[%s5674_s26 + $0x36c] ss:$52 sps:$4 sm:$0xff]   ;;  %v5316_v58 = vld [vmem:[%s5674_s26 + $0x30] ss:$52 sps:$4 sm:$0xff]  }
 0x1c5   : > { %v6001_v7 = vadd.f32 %v4297_v18, %v5939_v27  ;;  %v6004_v40 = vadd.f32 %v4361_v31, %v5886_v25  ;;  %3187 = vmatprep.mubr.bf16.mxu0 %v5301_v55  ;;  %3284 = vmatprep.mubr.bf16.mxu1 %v5303_v59 }
 0x1c7   : > { %v4298_v42 = vpop.f32.mrb[60].mxu1  ;;  %v4362_v53 = vpop.f32.mrb[60].mxu0 }
 0x1c8   : > { %v4299_v12 = vpop.f32.mrb[61].mxu1  ;;  %v4363_v13 = vpop.f32.mrb[61].mxu0 }
 0x1c9   : > { %v4300_v16 = vadd.f32 %v4299_v12, %v4298_v42  ;;  %v4364_v19 = vadd.f32 %v4363_v13, %v4362_v53  ;;  %v4301_v34 = vpop.f32.mrb[62].mxu1  ;;  %v4365_v48 = vpop.f32.mrb[62].mxu0 }
 0x1ca   : > { %v4302_v44 = vpop.f32.mrb[63].mxu1  ;;  %v4366_v27 = vpop.f32.mrb[63].mxu0 }
 0x1cb   : > { %v6011_v25 = vadd.f32 %v4300_v16, %v5946_v15  ;;  %v6014_v35 = vadd.f32 %v4364_v19, %v5895_v49  ;;  %v4303_v43 = vadd.f32 %v4302_v44, %v4301_v34  ;;  %v4367_v22 = vadd.f32 %v4366_v27, %v4365_v48  ;;  %v5312_v49 = vld [vmem:[%s5674_s26 + $0x638] ss:$52 sps:$4 sm:$0xff]   ;;  %v5319_v44 = vld [vmem:[%s5674_s26 + $0x3d4] ss:$52 sps:$4 sm:$0xff]  }
 0x1cc   : > { %3188 = vmatmul.mubr.bf16.gmra.mrb[168].mxu0 %v5305_v20  ;;  %3285 = vmatmul.mubr.bf16.gmra.mrb[168].mxu1 %v5306_v14  ;;  %v5318_v19 = vld [vmem:[%s5674_s26 + $0x98] ss:$52 sps:$4 sm:$0xff]   ;;  %v5321_v27 = vld [vmem:[%s5674_s26 + $0x100] ss:$52 sps:$4 sm:$0xff]  }
 0x1cd   : > { %v6017_v45 = vadd.f32 %v4303_v43, %v5953_v29  ;;  %v6020_v37 = vadd.f32 %v4367_v22, %v5900_v51  ;;  %3195 = vmatprep.mubr.bf16.mxu0 %v5308_v24  ;;  %3292 = vmatprep.mubr.bf16.mxu1 %v5310_v8 }
 0x1cf   : > { %v4304_v62 = vpop.f32.mrb[64].mxu1  ;;  %v4368_v15 = vpop.f32.mrb[64].mxu0 }
 0x1d0   : > { %v4305_v0 = vpop.f32.mrb[65].mxu1  ;;  %v4369_v23 = vpop.f32.mrb[65].mxu0 }
 0x1d1   : > { %v4306_v52 = vadd.f32 %v4305_v0, %v4304_v62  ;;  %v4370_v54 = vadd.f32 %v4369_v23, %v4368_v15  ;;  %v4307_v55 = vpop.f32.mrb[66].mxu1  ;;  %v4371_v59 = vpop.f32.mrb[66].mxu0 }
 0x1d2   : > { %v4308_v18 = vpop.f32.mrb[67].mxu1  ;;  %v4372_v29 = vpop.f32.mrb[67].mxu0 }
 0x1d3   : > { %v6027_v51 = vadd.f32 %v4306_v52, %v5799_v21  ;;  %v6030_v31 = vadd.f32 %v4370_v54, %v5909_v6  ;;  %v4309_v42 = vadd.f32 %v4308_v18, %v4307_v55  ;;  %v4373_v53 = vadd.f32 %v4372_v29, %v4371_v59  ;;  %v5317_v6 = vld [vmem:[%s5674_s26 + $0x368] ss:$52 sps:$4 sm:$0xff]   ;;  %v5326_v29 = vld [vmem:[%s5674_s26 + $0x1d0] ss:$52 sps:$4 sm:$0xff]  }
 0x1d4   : > { %3196 = vmatmul.mubr.bf16.gmra.mrb[172].mxu0 %v5312_v49  ;;  %3293 = vmatmul.mubr.bf16.gmra.mrb[172].mxu1 %v5313_v57  ;;  %v5323_v54 = vld [vmem:[%s5674_s26 + $0x168] ss:$52 sps:$4 sm:$0xff]  }
 0x1d5   : > { %v6033_v12 = vadd.f32 %v4309_v42, %v5805_v30  ;;  %v6036_v13 = vadd.f32 %v4373_v53, %v5914_v10  ;;  %3300 = vmatprep.mubr.bf16.mxu1 %v5314_v2  ;;  %4816 = vmatprep.mubr.bf16.mxu0 %v5316_v58  ;;  %v5324_v18 = vld [vmem:[%s5674_s26 + $0x43c] ss:$52 sps:$4 sm:$0xff]  }
 0x1d7   : > { %v4310_v20 = vpop.f32.mrb[68].mxu1  ;;  %v4374_v21 = vpop.f32.mrb[68].mxu0 }
 0x1d8   : > { %v4311_v14 = vpop.f32.mrb[69].mxu1  ;;  %v4375_v16 = vpop.f32.mrb[69].mxu0 }
 0x1d9   : > { %v4312_v34 = vadd.f32 %v4311_v14, %v4310_v20  ;;  %v4376_v48 = vadd.f32 %v4375_v16, %v4374_v21  ;;  %v4313_v24 = vpop.f32.mrb[70].mxu1  ;;  %v4377_v8 = vpop.f32.mrb[70].mxu0 }
 0x1da   : > { %v4314_v43 = vpop.f32.mrb[71].mxu1  ;;  %v4378_v30 = vpop.f32.mrb[71].mxu0 }
 0x1db   : > { %v6043_v10 = vadd.f32 %v4312_v34, %v5811_v38  ;;  %v6046_v22 = vadd.f32 %v4376_v48, %v5923_v33  ;;  %v4315_v62 = vadd.f32 %v4314_v43, %v4313_v24  ;;  %v4379_v15 = vadd.f32 %v4378_v30, %v4377_v8  ;;  %v5322_v33 = vld [vmem:[%s5674_s26 + $0x3d0] ss:$52 sps:$4 sm:$0xff]   ;;  %v5328_v48 = vld [vmem:[%s5674_s26 + $0x238] ss:$52 sps:$4 sm:$0xff]   ;;  %v5331_v30 = vld [vmem:[%s5674_s26 + $0x2a0] ss:$52 sps:$4 sm:$0xff]  }
 0x1dc   : > { %3301 = vmatmul.mubr.bf16.gmra.mrb[176].mxu1 %v5317_v6  ;;  %4817 = vmatmul.mubr.bf16.vlgmr.msra.gmra.mrb[176].mxu0 %v5318_v19  ;;  %v5329_v43 = vld [vmem:[%s5674_s26 + $0x4a4] ss:$52 sps:$4 sm:$0xff]  }
 0x1dd   : > { %v6049_v0 = vadd.f32 %v4315_v62, %v5817_v47  ;;  %v6052_v23 = vadd.f32 %v4379_v15, %v5928_v36  ;;  %3308 = vmatprep.mubr.bf16.mxu1 %v5319_v44  ;;  %4820 = vmatprep.mubr.bf16.mxu0 %v5321_v27 }
 0x1df   : > { %v4316_v49 = vpop.f32.mrb[72].mxu1  ;;  %v4380_v38 = vpop.f32.mrb[72].mxu0 }
 0x1e0   : > { %v4317_v57 = vpop.f32.mrb[73].mxu1  ;;  %v4381_v52 = vpop.f32.mrb[73].mxu0 }
 0x1e1   : > { %v4318_v55 = vadd.f32 %v4317_v57, %v4316_v49  ;;  %v4382_v59 = vadd.f32 %v4381_v52, %v4380_v38  ;;  %v4319_v2 = vpop.f32.mrb[74].mxu1  ;;  %v4383_v58 = vpop.f32.mrb[74].mxu0 }
 0x1e2   : > { %v4320_v42 = vpop.f32.mrb[75].mxu1  ;;  %v4384_v47 = vpop.f32.mrb[75].mxu0 }
 0x1e3   : > { %v6059_v36 = vadd.f32 %v4318_v55, %v5824_v56  ;;  %v6062_v53 = vadd.f32 %v4382_v59, %v5937_v11  ;;  %v4321_v20 = vadd.f32 %v4320_v42, %v4319_v2  ;;  %v4385_v21 = vadd.f32 %v4384_v47, %v4383_v58  ;;  %v5327_v11 = vld [vmem:[%s5674_s26 + $0x438] ss:$52 sps:$4 sm:$0xff]   ;;  %v5333_v59 = vld [vmem:[%s5674_s26 + $0x308] ss:$52 sps:$4 sm:$0xff]   ;;  %v5336_v47 = vld [vmem:[%s5674_s26 + $0x370] ss:$52 sps:$4 sm:$0xff]  }
 0x1e4   : > { %3309 = vmatmul.mubr.bf16.gmra.mrb[180].mxu1 %v5322_v33  ;;  %4821 = vmatmul.mubr.bf16.gmra.mrb[180].mxu0 %v5323_v54  ;;  %v5334_v42 = vld [vmem:[%s5674_s26 + $0x50c] ss:$52 sps:$4 sm:$0xff]  }
 0x1e5   : > { %v6065_v14 = vadd.f32 %v4321_v20, %v5830_v63  ;;  %v6068_v16 = vadd.f32 %v4385_v21, %v5942_v1  ;;  %3316 = vmatprep.mubr.bf16.mxu1 %v5324_v18  ;;  %4824 = vmatprep.mubr.bf16.mxu0 %v5326_v29 }
 0x1e7   : > { %v4322_v6 = vpop.f32.mrb[76].mxu1  ;;  %v4386_v56 = vpop.f32.mrb[76].mxu0 }
 0x1e8   : > { %v4323_v19 = vpop.f32.mrb[77].mxu1  ;;  %v4387_v34 = vpop.f32.mrb[77].mxu0 }
 0x1e9   : > { %v4324_v24 = vadd.f32 %v4323_v19, %v4322_v6  ;;  %v4388_v8 = vadd.f32 %v4387_v34, %v4386_v56  ;;  %v4325_v44 = vpop.f32.mrb[78].mxu1  ;;  %v4389_v27 = vpop.f32.mrb[78].mxu0 }
 0x1ea   : > { %v4326_v62 = vpop.f32.mrb[79].mxu1  ;;  %v4390_v63 = vpop.f32.mrb[79].mxu0 }
 0x1eb   : > { %v6075_v1 = vadd.f32 %v4324_v24, %v5836_v9  ;;  %v6078_v15 = vadd.f32 %v4388_v8, %v5951_v26  ;;  %v4327_v49 = vadd.f32 %v4326_v62, %v4325_v44  ;;  %v4391_v38 = vadd.f32 %v4390_v63, %v4389_v27  ;;  %v5332_v26 = vld [vmem:[%s5674_s26 + $0x4a0] ss:$52 sps:$4 sm:$0xff]   ;;  %v5338_v8 = vld [vmem:[%s5674_s26 + $0x3d8] ss:$52 sps:$4 sm:$0xff]  }
 0x1ec   : > { %3317 = vmatmul.mubr.bf16.gmra.mrb[184].mxu1 %v5327_v11  ;;  %4825 = vmatmul.mubr.bf16.gmra.mrb[184].mxu0 %v5328_v48  ;;  %v5339_v62 = vld [vmem:[%s5674_s26 + $0x574] ss:$52 sps:$4 sm:$0xff]  }
 0x1ed   : > { %v6081_v57 = vadd.f32 %v4327_v49, %v5842_v17  ;;  %v6084_v52 = vadd.f32 %v4391_v38, %v5956_v32  ;;  %3324 = vmatprep.mubr.bf16.mxu1 %v5329_v43  ;;  %4828 = vmatprep.mubr.bf16.mxu0 %v5331_v30  ;;  %v5341_v63 = vld [vmem:[%s5674_s26 + $0x440] ss:$52 sps:$4 sm:$0xff]  }
 0x1ef   : > { %v4392_v33 = vpop.f32.mrb[80].mxu0  ;;  %v4456_v9 = vpop.f32.mrb[80].mxu1 }
 0x1f0   : > { %v4393_v54 = vpop.f32.mrb[81].mxu0  ;;  %v4457_v55 = vpop.f32.mrb[81].mxu1 }
 0x1f1   : > { %v4394_v2 = vadd.f32 %v4393_v54, %v4392_v33  ;;  %v4458_v58 = vadd.f32 %v4457_v55, %v4456_v9  ;;  %v4395_v18 = vpop.f32.mrb[82].mxu0  ;;  %v4459_v29 = vpop.f32.mrb[82].mxu1 }
 0x1f2   : > { %v4396_v20 = vpop.f32.mrb[83].mxu0  ;;  %v4460_v17 = vpop.f32.mrb[83].mxu1 }
 0x1f3   : > { %v6091_v32 = vadd.f32 %v4394_v2, %v5963_v50  ;;  %v6094_v21 = vadd.f32 %v4458_v58, %v5966_v60  ;;  %v4397_v6 = vadd.f32 %v4396_v20, %v4395_v18  ;;  %v4461_v56 = vadd.f32 %v4460_v17, %v4459_v29  ;;  %v5337_v60 = vld [vmem:[%s5674_s26 + $0x508] ss:$52 sps:$4 sm:$0xff]   ;;  %v5346_v17 = vld [vmem:[%s5674_s26 + $0x510] ss:$52 sps:$4 sm:$0xff]  }
 0x1f4   : > { %3325 = vmatmul.mubr.bf16.gmra.mrb[188].mxu1 %v5332_v26  ;;  %4829 = vmatmul.mubr.bf16.gmra.mrb[188].mxu0 %v5333_v59  ;;  %v5343_v58 = vld [vmem:[%s5674_s26 + $0x4a8] ss:$52 sps:$4 sm:$0xff]  }
 0x1f5   : > { %v6097_v19 = vadd.f32 %v4397_v6, %v5969_v4  ;;  %v6100_v34 = vadd.f32 %v4461_v56, %v5972_v5  ;;  %3332 = vmatprep.mubr.bf16.mxu1 %v5334_v42  ;;  %4832 = vmatprep.mubr.bf16.mxu0 %v5336_v47  ;;  %v5344_v20 = vld [vmem:[%s5674_s26 + $0x5dc] ss:$52 sps:$4 sm:$0xff]  }
 0x1f7   : > { %v4398_v11 = vpop.f32.mrb[84].mxu0  ;;  %v4462_v50 = vpop.f32.mrb[84].mxu1 }
 0x1f8   : > { %v4399_v48 = vpop.f32.mrb[85].mxu0  ;;  %v4463_v24 = vpop.f32.mrb[85].mxu1 }
 0x1f9   : > { %v4400_v44 = vadd.f32 %v4399_v48, %v4398_v11  ;;  %v4464_v27 = vadd.f32 %v4463_v24, %v4462_v50  ;;  %v4401_v43 = vpop.f32.mrb[86].mxu0  ;;  %v4465_v30 = vpop.f32.mrb[86].mxu1 }
 0x1fa   : > { %v4402_v49 = vpop.f32.mrb[87].mxu0  ;;  %v4466_v4 = vpop.f32.mrb[87].mxu1 }
 0x1fb   : > { %v6107_v5 = vadd.f32 %v4400_v44, %v5979_v46  ;;  %v6110_v38 = vadd.f32 %v4464_v27, %v5982_v28  ;;  %v4403_v33 = vadd.f32 %v4402_v49, %v4401_v43  ;;  %v4467_v9 = vadd.f32 %v4466_v4, %v4465_v30  ;;  %v5342_v28 = vld [vmem:[%s5674_s26 + $0x570] ss:$52 sps:$4 sm:$0xff]   ;;  %v5348_v27 = vld [vmem:[%s5674_s26 + $0x578] ss:$52 sps:$4 sm:$0xff]   ;;  %v5351_v4 = vld [vmem:[%s5674_s26 + $0x5e0] ss:$52 sps:$4 sm:$0xff]  }
 0x1fc   : > { %3333 = vmatmul.mubr.bf16.gmra.mrb[192].mxu1 %v5337_v60  ;;  %4833 = vmatmul.mubr.bf16.gmra.mrb[192].mxu0 %v5338_v8  ;;  %v5349_v49 = vld [vmem:[%s5674_s26 + $0x644] ss:$52 sps:$4 sm:$0xff]  }
 0x1fd   : > { %v6113_v54 = vadd.f32 %v4403_v33, %v5985_v39  ;;  %v6116_v55 = vadd.f32 %v4467_v9, %v5988_v41  ;;  %3340 = vmatprep.mubr.bf16.mxu1 %v5339_v62  ;;  %4836 = vmatprep.mubr.bf16.mxu0 %v5341_v63 }
 0x1ff   : > { %v4404_v26 = vpop.f32.mrb[88].mxu0  ;;  %v4468_v46 = vpop.f32.mrb[88].mxu1 }
 0x200   : > { %v4405_v59 = vpop.f32.mrb[89].mxu0  ;;  %v4469_v2 = vpop.f32.mrb[89].mxu1 }
 0x201   : > { %v4406_v18 = vadd.f32 %v4405_v59, %v4404_v26  ;;  %v4470_v29 = vadd.f32 %v4469_v2, %v4468_v46  ;;  %v4407_v42 = vpop.f32.mrb[90].mxu0  ;;  %v4471_v47 = vpop.f32.mrb[90].mxu1 }
 0x202   : > { %v4408_v6 = vpop.f32.mrb[91].mxu0  ;;  %v4472_v39 = vpop.f32.mrb[91].mxu1 }
 0x203   : > { %v6123_v41 = vadd.f32 %v4406_v18, %v5995_v3  ;;  %v6126_v56 = vadd.f32 %v4470_v29, %v5998_v61  ;;  %v4409_v11 = vadd.f32 %v4408_v6, %v4407_v42  ;;  %v4473_v50 = vadd.f32 %v4472_v39, %v4471_v47  ;;  %v5347_v61 = vld [vmem:[%s5674_s26 + $0x5d8] ss:$52 sps:$4 sm:$0xff]   ;;  %v5352_v29 = vld [vmem:[%s5674_s26 + $0x640] ss:$52 sps:$4 sm:$0xff]   ;;  %v5353_v42 = vld [vmem:[%s5674_s26 + $0x648] ss:$52 sps:$4 sm:$0xff]  }
 0x204   : > { %3341 = vmatmul.mubr.bf16.gmra.mrb[196].mxu1 %v5342_v28  ;;  %4837 = vmatmul.mubr.bf16.gmra.mrb[196].mxu0 %v5343_v58 }
 0x205   : > { %v6129_v48 = vadd.f32 %v4409_v11, %v6001_v7  ;;  %v6132_v24 = vadd.f32 %v4473_v50, %v6004_v40  ;;  %3348 = vmatprep.mubr.bf16.mxu1 %v5344_v20  ;;  %4840 = vmatprep.mubr.bf16.mxu0 %v5346_v17 }
 0x207   : > { %v4410_v60 = vpop.f32.mrb[92].mxu0  ;;  %v4474_v3 = vpop.f32.mrb[92].mxu1 }
 0x208   : > { %v4411_v8 = vpop.f32.mrb[93].mxu0  ;;  %v4475_v44 = vpop.f32.mrb[93].mxu1 }
 0x209   : > { %v4412_v43 = vadd.f32 %v4411_v8, %v4410_v60  ;;  %v4476_v30 = vadd.f32 %v4475_v44, %v4474_v3  ;;  %v4413_v62 = vpop.f32.mrb[94].mxu0  ;;  %v4477_v63 = vpop.f32.mrb[94].mxu1 }
 0x20a   : > { %v4414_v33 = vpop.f32.mrb[95].mxu0  ;;  %v4478_v7 = vpop.f32.mrb[95].mxu1 }
 0x20b   : > { %v6139_v40 = vadd.f32 %v4412_v43, %v6011_v25  ;;  %v6142_v9 = vadd.f32 %v4476_v30, %v6014_v35  ;;  %v4415_v26 = vadd.f32 %v4414_v33, %v4413_v62  ;;  %v4479_v46 = vadd.f32 %v4478_v7, %v4477_v63 }
 0x20c   : > { %3349 = vmatmul.mubr.bf16.gmra.mrb[200].mxu1 %v5347_v61  ;;  %4841 = vmatmul.mubr.bf16.gmra.mrb[200].mxu0 %v5348_v27 }
 0x20d   : > { %v6145_v59 = vadd.f32 %v4415_v26, %v6017_v45  ;;  %v6148_v2 = vadd.f32 %v4479_v46, %v6020_v37  ;;  %3356 = vmatprep.mubr.bf16.mxu1 %v5349_v49  ;;  %4844 = vmatprep.mubr.bf16.mxu0 %v5351_v4 }
 0x20f   : > { %v4416_v28 = vpop.f32.mrb[96].mxu0  ;;  %v4480_v58 = vpop.f32.mrb[96].mxu1 }
 0x210   : > { %v4417_v18 = vpop.f32.mrb[97].mxu0  ;;  %v4481_v25 = vpop.f32.mrb[97].mxu1 }
 0x211   : > { %v4418_v35 = vadd.f32 %v4417_v18, %v4416_v28  ;;  %v4482_v47 = vadd.f32 %v4481_v25, %v4480_v58  ;;  %v4419_v20 = vpop.f32.mrb[98].mxu0  ;;  %v4483_v17 = vpop.f32.mrb[98].mxu1 }
 0x212   : > { %v4420_v6 = vpop.f32.mrb[99].mxu0  ;;  %v4484_v39 = vpop.f32.mrb[99].mxu1 }
 0x213   : > { %v6153_v45 = vadd.f32 %v4418_v35, %v6027_v51  ;;  %v6156_v37 = vadd.f32 %v4482_v47, %v6030_v31  ;;  %v4421_v11 = vadd.f32 %v4420_v6, %v4419_v20  ;;  %v4485_v50 = vadd.f32 %v4484_v39, %v4483_v17 }
 0x214   : > { %3357 = vmatmul.mubr.bf16.gmra.mrb[204].mxu1 %v5352_v29  ;;  %4845 = vmatmul.mubr.bf16.gmra.mrb[204].mxu0 %v5353_v42 }
 0x215   : > { %v6159_v60 = vadd.f32 %v4421_v11, %v6033_v12  ;;  %v6162_v3 = vadd.f32 %v4485_v50, %v6036_v13 }
 0x217   : > { %v4422_v8 = vpop.f32.mrb[100].mxu0  ;;  %v4486_v44 = vpop.f32.mrb[100].mxu1 }
 0x218   : > { %v4423_v61 = vpop.f32.mrb[101].mxu0  ;;  %v4487_v27 = vpop.f32.mrb[101].mxu1 }
 0x219   : > { %v4424_v43 = vadd.f32 %v4423_v61, %v4422_v8  ;;  %v4488_v51 = vadd.f32 %v4487_v27, %v4486_v44  ;;  %v4425_v30 = vpop.f32.mrb[102].mxu0  ;;  %v4489_v62 = vpop.f32.mrb[102].mxu1 }
 0x21a   : > { %v4426_v31 = vpop.f32.mrb[103].mxu0  ;;  %v4490_v63 = vpop.f32.mrb[103].mxu1 }
 0x21b   : > { %v6165_v49 = vadd.f32 %v4424_v43, %v6043_v10  ;;  %v6168_v4 = vadd.f32 %v4488_v51, %v6046_v22  ;;  %v4427_v12 = vadd.f32 %v4426_v31, %v4425_v30  ;;  %v4491_v33 = vadd.f32 %v4490_v63, %v4489_v62 }
 0x21d   : > { %v6171_v13 = vadd.f32 %v4427_v12, %v6049_v0  ;;  %v6174_v7 = vadd.f32 %v4491_v33, %v6052_v23 }
 0x21f   : > { %v4428_v26 = vpop.f32.mrb[104].mxu0  ;;  %v4492_v46 = vpop.f32.mrb[104].mxu1 }
 0x220   : > { %v4429_v28 = vpop.f32.mrb[105].mxu0  ;;  %v4493_v58 = vpop.f32.mrb[105].mxu1 }
 0x221   : > { %v4430_v18 = vadd.f32 %v4429_v28, %v4428_v26  ;;  %v4494_v25 = vadd.f32 %v4493_v58, %v4492_v46  ;;  %v4431_v29 = vpop.f32.mrb[106].mxu0  ;;  %v4495_v10 = vpop.f32.mrb[106].mxu1 }
 0x222   : > { %v4432_v42 = vpop.f32.mrb[107].mxu0  ;;  %v4496_v35 = vpop.f32.mrb[107].mxu1 }
 0x223   : > { %v6177_v22 = vadd.f32 %v4430_v18, %v6059_v36  ;;  %v6180_v47 = vadd.f32 %v4494_v25, %v6062_v53  ;;  %v4433_v0 = vadd.f32 %v4432_v42, %v4431_v29  ;;  %v4497_v20 = vadd.f32 %v4496_v35, %v4495_v10 }
 0x225   : > { %v6183_v23 = vadd.f32 %v4433_v0, %v6065_v14  ;;  %v6186_v17 = vadd.f32 %v4497_v20, %v6068_v16 }
 0x227   : > { %v4434_v6 = vpop.f32.mrb[108].mxu0  ;;  %v4498_v39 = vpop.f32.mrb[108].mxu1 }
 0x228   : > { %v4435_v11 = vpop.f32.mrb[109].mxu0  ;;  %v4499_v50 = vpop.f32.mrb[109].mxu1 }
 0x229   : > { %v4436_v8 = vadd.f32 %v4435_v11, %v4434_v6  ;;  %v4500_v44 = vadd.f32 %v4499_v50, %v4498_v39  ;;  %v4437_v61 = vpop.f32.mrb[110].mxu0  ;;  %v4501_v36 = vpop.f32.mrb[110].mxu1 }
 0x22a   : > { %v4438_v27 = vpop.f32.mrb[111].mxu0  ;;  %v4502_v43 = vpop.f32.mrb[111].mxu1 }
 0x22b   : > { %v6189_v53 = vadd.f32 %v4436_v8, %v6075_v1  ;;  %v6192_v51 = vadd.f32 %v4500_v44, %v6078_v15  ;;  %v4439_v14 = vadd.f32 %v4438_v27, %v4437_v61  ;;  %v4503_v30 = vadd.f32 %v4502_v43, %v4501_v36 }
 0x22d   : > { %v6195_v16 = vadd.f32 %v4439_v14, %v6081_v57  ;;  %v6198_v62 = vadd.f32 %v4503_v30, %v6084_v52 }
 0x22f   : > { %v4504_v31 = vpop.f32.mrb[112].mxu1  ;;  %v4568_v63 = vpop.f32.mrb[112].mxu0 }
 0x230   : > { %v4505_v12 = vpop.f32.mrb[113].mxu1  ;;  %v4569_v33 = vpop.f32.mrb[113].mxu0 }
 0x231   : > { %v4506_v26 = vadd.f32 %v4505_v12, %v4504_v31  ;;  %v4570_v46 = vadd.f32 %v4569_v33, %v4568_v63  ;;  %v4507_v28 = vpop.f32.mrb[114].mxu1  ;;  %v4571_v1 = vpop.f32.mrb[114].mxu0 }
 0x232   : > { %v4508_v58 = vpop.f32.mrb[115].mxu1  ;;  %v4572_v18 = vpop.f32.mrb[115].mxu0 }
 0x233   : > { %v6201_v15 = vadd.f32 %v4506_v26, %v6091_v32  ;;  %v6204_v25 = vadd.f32 %v4570_v46, %v6094_v21  ;;  %v4509_v57 = vadd.f32 %v4508_v58, %v4507_v28  ;;  %v4573_v29 = vadd.f32 %v4572_v18, %v4571_v1 }
 0x235   : > { %v6207_v52 = vadd.f32 %v4509_v57, %v6097_v19  ;;  %v6210_v10 = vadd.f32 %v4573_v29, %v6100_v34 }
 0x237   : > { %v4510_v42 = vpop.f32.mrb[116].mxu1  ;;  %v4574_v35 = vpop.f32.mrb[116].mxu0 }
 0x238   : > { %v4511_v0 = vpop.f32.mrb[117].mxu1  ;;  %v4575_v20 = vpop.f32.mrb[117].mxu0 }
 0x239   : > { %v4512_v6 = vadd.f32 %v4511_v0, %v4510_v42  ;;  %v4576_v39 = vadd.f32 %v4575_v20, %v4574_v35  ;;  %v4513_v11 = vpop.f32.mrb[118].mxu1  ;;  %v4577_v32 = vpop.f32.mrb[118].mxu0 }
 0x23a   : > { %v4514_v50 = vpop.f32.mrb[119].mxu1  ;;  %v4578_v8 = vpop.f32.mrb[119].mxu0 }
 0x23b   : > { %v6213_v21 = vadd.f32 %v4512_v6, %v6107_v5  ;;  %v6216_v44 = vadd.f32 %v4576_v39, %v6110_v38  ;;  %v4515_v19 = vadd.f32 %v4514_v50, %v4513_v11  ;;  %v4579_v61 = vadd.f32 %v4578_v8, %v4577_v32 }
 0x23d   : > { %v6219_v34 = vadd.f32 %v4515_v19, %v6113_v54  ;;  %v6222_v36 = vadd.f32 %v4579_v61, %v6116_v55 }
 0x23f   : > { %v4516_v27 = vpop.f32.mrb[120].mxu1  ;;  %v4580_v43 = vpop.f32.mrb[120].mxu0 }
 0x240   : > { %v4517_v14 = vpop.f32.mrb[121].mxu1  ;;  %v4581_v30 = vpop.f32.mrb[121].mxu0 }
 0x241   : > { %v4518_v31 = vadd.f32 %v4517_v14, %v4516_v27  ;;  %v4582_v63 = vadd.f32 %v4581_v30, %v4580_v43  ;;  %v4519_v12 = vpop.f32.mrb[122].mxu1  ;;  %v4583_v5 = vpop.f32.mrb[122].mxu0 }
 0x242   : > { %v4520_v33 = vpop.f32.mrb[123].mxu1  ;;  %v4584_v26 = vpop.f32.mrb[123].mxu0 }
 0x243   : > { %v6225_v38 = vadd.f32 %v4518_v31, %v6123_v41  ;;  %v6228_v46 = vadd.f32 %v4582_v63, %v6126_v56  ;;  %v4521_v54 = vadd.f32 %v4520_v33, %v4519_v12  ;;  %v4585_v28 = vadd.f32 %v4584_v26, %v4583_v5 }
 0x245   : > { %v6231_v55 = vadd.f32 %v4521_v54, %v6129_v48  ;;  %v6234_v1 = vadd.f32 %v4585_v28, %v6132_v24 }
 0x247   : > { %v4522_v58 = vpop.f32.mrb[124].mxu1  ;;  %v4586_v18 = vpop.f32.mrb[124].mxu0 }
 0x248   : > { %v4523_v57 = vpop.f32.mrb[125].mxu1  ;;  %v4587_v29 = vpop.f32.mrb[125].mxu0 }
 0x249   : > { %v4524_v42 = vadd.f32 %v4523_v57, %v4522_v58  ;;  %v4588_v35 = vadd.f32 %v4587_v29, %v4586_v18  ;;  %v4525_v0 = vpop.f32.mrb[126].mxu1  ;;  %v4589_v41 = vpop.f32.mrb[126].mxu0 }
 0x24a   : > { %v4526_v20 = vpop.f32.mrb[127].mxu1  ;;  %v4590_v6 = vpop.f32.mrb[127].mxu0 }
 0x24b   : > { %v6237_v56 = vadd.f32 %v4524_v42, %v6139_v40  ;;  %v6240_v39 = vadd.f32 %v4588_v35, %v6142_v9  ;;  %v4527_v48 = vadd.f32 %v4526_v20, %v4525_v0  ;;  %v4591_v11 = vadd.f32 %v4590_v6, %v4589_v41 }
 0x24d   : > { %v6243_v24 = vadd.f32 %v4527_v48, %v6145_v59  ;;  %v6246_v32 = vadd.f32 %v4591_v11, %v6148_v2 }
 0x24f   : > { %v4528_v50 = vpop.f32.mrb[128].mxu1  ;;  %v4592_v8 = vpop.f32.mrb[128].mxu0 }
 0x250   : > { %v4529_v19 = vpop.f32.mrb[129].mxu1  ;;  %v4593_v61 = vpop.f32.mrb[129].mxu0 }
 0x251   : > { %v4530_v27 = vadd.f32 %v4529_v19, %v4528_v50  ;;  %v4594_v43 = vadd.f32 %v4593_v61, %v4592_v8  ;;  %v4531_v14 = vpop.f32.mrb[130].mxu1  ;;  %v4595_v40 = vpop.f32.mrb[130].mxu0 }
 0x252   : > { %v4532_v30 = vpop.f32.mrb[131].mxu1  ;;  %v4596_v31 = vpop.f32.mrb[131].mxu0 }
 0x253   : > { %v6249_v9 = vadd.f32 %v4530_v27, %v6153_v45  ;;  %v6252_v63 = vadd.f32 %v4594_v43, %v6156_v37  ;;  %v4533_v59 = vadd.f32 %v4532_v30, %v4531_v14  ;;  %v4597_v12 = vadd.f32 %v4596_v31, %v4595_v40 }
 0x255   : > { %v6255_v2 = vadd.f32 %v4533_v59, %v6159_v60  ;;  %v6258_v5 = vadd.f32 %v4597_v12, %v6162_v3 }
 0x257   : > { %v4534_v33 = vpop.f32.mrb[132].mxu1  ;;  %v4598_v26 = vpop.f32.mrb[132].mxu0 }
 0x258   : > { %v4535_v54 = vpop.f32.mrb[133].mxu1  ;;  %v4599_v28 = vpop.f32.mrb[133].mxu0 }
 0x259   : > { %v4536_v58 = vadd.f32 %v4535_v54, %v4534_v33  ;;  %v4600_v18 = vadd.f32 %v4599_v28, %v4598_v26  ;;  %v4537_v57 = vpop.f32.mrb[134].mxu1  ;;  %v4601_v45 = vpop.f32.mrb[134].mxu0 }
 0x25a   : > { %v4538_v29 = vpop.f32.mrb[135].mxu1  ;;  %v4602_v42 = vpop.f32.mrb[135].mxu0 }
 0x25b   : > { %v6261_v37 = vadd.f32 %v4536_v58, %v6165_v49  ;;  %v6264_v35 = vadd.f32 %v4600_v18, %v6168_v4  ;;  %v4539_v60 = vadd.f32 %v4538_v29, %v4537_v57  ;;  %v4603_v0 = vadd.f32 %v4602_v42, %v4601_v45 }
 0x25d   : > { %v6267_v3 = vadd.f32 %v4539_v60, %v6171_v13  ;;  %v6270_v41 = vadd.f32 %v4603_v0, %v6174_v7 }
 0x25f   : > { %v4540_v20 = vpop.f32.mrb[136].mxu1  ;;  %v4604_v6 = vpop.f32.mrb[136].mxu0 }
 0x260   : > { %v4541_v48 = vpop.f32.mrb[137].mxu1  ;;  %v4605_v11 = vpop.f32.mrb[137].mxu0 }
 0x261   : > { %v4542_v50 = vadd.f32 %v4541_v48, %v4540_v20  ;;  %v4606_v8 = vadd.f32 %v4605_v11, %v4604_v6  ;;  %v4543_v19 = vpop.f32.mrb[138].mxu1  ;;  %v4607_v49 = vpop.f32.mrb[138].mxu0 }
 0x262   : > { %v4544_v61 = vpop.f32.mrb[139].mxu1  ;;  %v4608_v27 = vpop.f32.mrb[139].mxu0 }
 0x263   : > { %v6273_v4 = vadd.f32 %v4542_v50, %v6177_v22  ;;  %v6276_v43 = vadd.f32 %v4606_v8, %v6180_v47  ;;  %v4545_v13 = vadd.f32 %v4544_v61, %v4543_v19  ;;  %v4609_v14 = vadd.f32 %v4608_v27, %v4607_v49 }
 0x265   : > { %v6279_v7 = vadd.f32 %v4545_v13, %v6183_v23  ;;  %v6282_v40 = vadd.f32 %v4609_v14, %v6186_v17 }
 0x267   : > { %v4546_v30 = vpop.f32.mrb[140].mxu1  ;;  %v4610_v31 = vpop.f32.mrb[140].mxu0 }
 0x268   : > { %v4547_v59 = vpop.f32.mrb[141].mxu1  ;;  %v4611_v12 = vpop.f32.mrb[141].mxu0 }
 0x269   : > { %v4548_v33 = vadd.f32 %v4547_v59, %v4546_v30  ;;  %v4612_v26 = vadd.f32 %v4611_v12, %v4610_v31  ;;  %v4549_v54 = vpop.f32.mrb[142].mxu1  ;;  %v4613_v22 = vpop.f32.mrb[142].mxu0 }
 0x26a   : > { %v4550_v28 = vpop.f32.mrb[143].mxu1  ;;  %v4614_v58 = vpop.f32.mrb[143].mxu0 }
 0x26b   : > { %v6285_v47 = vadd.f32 %v4548_v33, %v6189_v53  ;;  %v6288_v18 = vadd.f32 %v4612_v26, %v6192_v51  ;;  %v4551_v23 = vadd.f32 %v4550_v28, %v4549_v54  ;;  %v4615_v57 = vadd.f32 %v4614_v58, %v4613_v22 }
 0x26d   : > { %v6291_v17 = vadd.f32 %v4551_v23, %v6195_v16  ;;  %v6294_v45 = vadd.f32 %v4615_v57, %v6198_v62 }
 0x26f   : > { %v4616_v29 = vpop.f32.mrb[144].mxu0  ;;  %v4680_v42 = vpop.f32.mrb[144].mxu1 }
 0x270   : > { %v4617_v60 = vpop.f32.mrb[145].mxu0  ;;  %v4681_v0 = vpop.f32.mrb[145].mxu1 }
 0x271   : > { %v4618_v20 = vadd.f32 %v4617_v60, %v4616_v29  ;;  %v4682_v6 = vadd.f32 %v4681_v0, %v4680_v42  ;;  %v4619_v48 = vpop.f32.mrb[146].mxu0  ;;  %v4683_v53 = vpop.f32.mrb[146].mxu1 }
 0x272   : > { %v4620_v11 = vpop.f32.mrb[147].mxu0  ;;  %v4684_v50 = vpop.f32.mrb[147].mxu1 }
 0x273   : > { %v6297_v51 = vadd.f32 %v4618_v20, %v6201_v15  ;;  %v4621_v8 = vadd.f32 %v4620_v11, %v4619_v48  ;;  %v4685_v19 = vadd.f32 %v4684_v50, %v4683_v53  ;;  %v6300_v16 = vadd.f32 %v4682_v6, %v6204_v25 }
 0x275   : > { %v6303_v62 = vadd.f32 %v4621_v8, %v6207_v52  ;;  %v6306_v49 = vadd.f32 %v4685_v19, %v6210_v10 }
 0x277   : > { %v4622_v61 = vpop.f32.mrb[148].mxu0  ;;  %v4686_v27 = vpop.f32.mrb[148].mxu1 }
 0x278   : > { %v4623_v13 = vpop.f32.mrb[149].mxu0  ;;  %v4687_v14 = vpop.f32.mrb[149].mxu1 }
 0x279   : > { %v4624_v30 = vadd.f32 %v4623_v13, %v4622_v61  ;;  %v4688_v31 = vadd.f32 %v4687_v14, %v4686_v27  ;;  %v4625_v59 = vpop.f32.mrb[150].mxu0  ;;  %v4689_v15 = vpop.f32.mrb[150].mxu1 }
 0x27a   : > { %v4626_v12 = vpop.f32.mrb[151].mxu0  ;;  %v4690_v33 = vpop.f32.mrb[151].mxu1 }
 0x27b   : > { %v6309_v26 = vadd.f32 %v4624_v30, %v6213_v21  ;;  %v4627_v25 = vadd.f32 %v4626_v12, %v4625_v59  ;;  %v4691_v54 = vadd.f32 %v4690_v33, %v4689_v15  ;;  %v6312_v52 = vadd.f32 %v4688_v31, %v6216_v44 }
 0x27d   : > { %v6315_v10 = vadd.f32 %v4627_v25, %v6219_v34  ;;  %v6318_v22 = vadd.f32 %v4691_v54, %v6222_v36 }
 0x27f   : > { %v4628_v28 = vpop.f32.mrb[152].mxu0  ;;  %v4692_v58 = vpop.f32.mrb[152].mxu1 }
 0x280   : > { %v4629_v23 = vpop.f32.mrb[153].mxu0  ;;  %v4693_v57 = vpop.f32.mrb[153].mxu1 }
 0x281   : > { %v4630_v29 = vadd.f32 %v4629_v23, %v4628_v28  ;;  %v4694_v42 = vadd.f32 %v4693_v57, %v4692_v58  ;;  %v4631_v60 = vpop.f32.mrb[154].mxu0  ;;  %v4695_v21 = vpop.f32.mrb[154].mxu1 }
 0x282   : > { %v4632_v0 = vpop.f32.mrb[155].mxu0  ;;  %v4696_v20 = vpop.f32.mrb[155].mxu1 }
 0x283   : > { %v6321_v6 = vadd.f32 %v4630_v29, %v6225_v38  ;;  %v4633_v44 = vadd.f32 %v4632_v0, %v4631_v60  ;;  %v4697_v48 = vadd.f32 %v4696_v20, %v4695_v21  ;;  %v6324_v34 = vadd.f32 %v4694_v42, %v6228_v46 }
 0x285   : > { %v6327_v36 = vadd.f32 %v4633_v44, %v6231_v55  ;;  %v6330_v53 = vadd.f32 %v4697_v48, %v6234_v1 }
 0x287   : > { %v4634_v11 = vpop.f32.mrb[156].mxu0  ;;  %v4698_v50 = vpop.f32.mrb[156].mxu1 }
 0x288   : > { %v4635_v8 = vpop.f32.mrb[157].mxu0  ;;  %v4699_v19 = vpop.f32.mrb[157].mxu1 }
 0x289   : > { %v4636_v61 = vadd.f32 %v4635_v8, %v4634_v11  ;;  %v4700_v27 = vadd.f32 %v4699_v19, %v4698_v50  ;;  %v4637_v13 = vpop.f32.mrb[158].mxu0  ;;  %v4701_v38 = vpop.f32.mrb[158].mxu1 }
 0x28a   : > { %v4638_v14 = vpop.f32.mrb[159].mxu0  ;;  %v4702_v30 = vpop.f32.mrb[159].mxu1 }
 0x28b   : > { %v6333_v31 = vadd.f32 %v4636_v61, %v6237_v56  ;;  %v4639_v46 = vadd.f32 %v4638_v14, %v4637_v13  ;;  %v4703_v59 = vadd.f32 %v4702_v30, %v4701_v38  ;;  %v6336_v55 = vadd.f32 %v4700_v27, %v6240_v39 }
 0x28d   : > { %v6339_v1 = vadd.f32 %v4639_v46, %v6243_v24  ;;  %v6342_v15 = vadd.f32 %v4703_v59, %v6246_v32 }
 0x28f   : > { %v4640_v12 = vpop.f32.mrb[160].mxu0  ;;  %v4704_v33 = vpop.f32.mrb[160].mxu1 }
 0x290   : > { %v4641_v25 = vpop.f32.mrb[161].mxu0  ;;  %v4705_v54 = vpop.f32.mrb[161].mxu1 }
 0x291   : > { %v4642_v28 = vadd.f32 %v4641_v25, %v4640_v12  ;;  %v4706_v58 = vadd.f32 %v4705_v54, %v4704_v33  ;;  %v4643_v23 = vpop.f32.mrb[162].mxu0  ;;  %v4707_v56 = vpop.f32.mrb[162].mxu1 }
 0x292   : > { %v4644_v57 = vpop.f32.mrb[163].mxu0  ;;  %v4708_v29 = vpop.f32.mrb[163].mxu1 }
 0x293   : > { %v6345_v42 = vadd.f32 %v4642_v28, %v6249_v9  ;;  %v4645_v39 = vadd.f32 %v4644_v57, %v4643_v23  ;;  %v4709_v60 = vadd.f32 %v4708_v29, %v4707_v56  ;;  %v6348_v24 = vadd.f32 %v4706_v58, %v6252_v63 }
 0x295   : > { %v6351_v32 = vadd.f32 %v4645_v39, %v6255_v2  ;;  %v6354_v21 = vadd.f32 %v4709_v60, %v6258_v5 }
 0x297   : > { %v4646_v0 = vpop.f32.mrb[164].mxu0  ;;  %v4710_v20 = vpop.f32.mrb[164].mxu1 }
 0x298   : > { %v4647_v44 = vpop.f32.mrb[165].mxu0  ;;  %v4711_v48 = vpop.f32.mrb[165].mxu1 }
 0x299   : > { %v4648_v11 = vadd.f32 %v4647_v44, %v4646_v0  ;;  %v4712_v50 = vadd.f32 %v4711_v48, %v4710_v20  ;;  %v4649_v8 = vpop.f32.mrb[166].mxu0  ;;  %v4713_v9 = vpop.f32.mrb[166].mxu1 }
 0x29a   : > { %v4650_v19 = vpop.f32.mrb[167].mxu0  ;;  %v4714_v61 = vpop.f32.mrb[167].mxu1 }
 0x29b   : > { %v6357_v27 = vadd.f32 %v4648_v11, %v6261_v37  ;;  %v4651_v63 = vadd.f32 %v4650_v19, %v4649_v8  ;;  %v4715_v13 = vadd.f32 %v4714_v61, %v4713_v9  ;;  %v6360_v2 = vadd.f32 %v4712_v50, %v6264_v35 }
 0x29d   : > { %v6363_v5 = vadd.f32 %v4651_v63, %v6267_v3  ;;  %v6366_v38 = vadd.f32 %v4715_v13, %v6270_v41 }
 0x29f   : > { %v4652_v14 = vpop.f32.mrb[168].mxu0  ;;  %v4716_v30 = vpop.f32.mrb[168].mxu1 }
 0x2a0   : > { %v4653_v46 = vpop.f32.mrb[169].mxu0  ;;  %v4717_v59 = vpop.f32.mrb[169].mxu1 }
 0x2a1   : > { %v4654_v12 = vadd.f32 %v4653_v46, %v4652_v14  ;;  %v4718_v33 = vadd.f32 %v4717_v59, %v4716_v30  ;;  %v4655_v25 = vpop.f32.mrb[170].mxu0  ;;  %v4719_v37 = vpop.f32.mrb[170].mxu1 }
 0x2a2   : > { %v4656_v54 = vpop.f32.mrb[171].mxu0  ;;  %v4720_v28 = vpop.f32.mrb[171].mxu1 }
 0x2a3   : > { %v6369_v58 = vadd.f32 %v4654_v12, %v6273_v4  ;;  %v4657_v35 = vadd.f32 %v4656_v54, %v4655_v25  ;;  %v4721_v23 = vadd.f32 %v4720_v28, %v4719_v37  ;;  %v6372_v3 = vadd.f32 %v4718_v33, %v6276_v43 }
 0x2a5   : > { %v6375_v41 = vadd.f32 %v4657_v35, %v6279_v7  ;;  %v6378_v56 = vadd.f32 %v4721_v23, %v6282_v40 }
 0x2a7   : > { %v4658_v57 = vpop.f32.mrb[172].mxu0  ;;  %v4722_v29 = vpop.f32.mrb[172].mxu1 }
 0x2a8   : > { %v4659_v39 = vpop.f32.mrb[173].mxu0  ;;  %v4723_v60 = vpop.f32.mrb[173].mxu1 }
 0x2a9   : > { %v4660_v0 = vadd.f32 %v4659_v39, %v4658_v57  ;;  %v4724_v20 = vadd.f32 %v4723_v60, %v4722_v29  ;;  %v4661_v4 = vpop.f32.mrb[174].mxu0  ;;  %v4725_v44 = vpop.f32.mrb[174].mxu1 }
 0x2aa   : > { %v4662_v48 = vpop.f32.mrb[175].mxu0  ;;  %v4726_v11 = vpop.f32.mrb[175].mxu1 }
 0x2ab   : > { %v6381_v43 = vadd.f32 %v4660_v0, %v6285_v47  ;;  %v4663_v50 = vadd.f32 %v4662_v48, %v4661_v4  ;;  %v4727_v7 = vadd.f32 %v4726_v11, %v4725_v44  ;;  %v6384_v8 = vadd.f32 %v4724_v20, %v6288_v18 }
 0x2ad   : > { %v6388_v40 = vadd.f32 %v4663_v50, %v6291_v17  ;;  %v6391_v9 = vadd.f32 %v4727_v7, %v6294_v45 }
 0x2af   : > { %v4728_v19 = vpop.f32.mrb[176].mxu1  ;;  %v4818_v61 = vpop.f32.mrb[176].mxu0 }
 0x2b0   : > { %v3408_v63 = vadd.f32 %v4818_v61, %v6312_v52  ;;  %v4729_v13 = vpop.f32.mrb[177].mxu1  ;;  %v3399_v14 = vpop.f32.mrb[177].mxu0 }
 0x2b1   : > { %v4730_v47 = vadd.f32 %v4729_v13, %v4728_v19  ;;  %v3400_v30 = vadd.f32 %v3399_v14, %v6300_v16  ;;  %v4731_v46 = vpop.f32.mrb[178].mxu1  ;;  %v4819_v59 = vpop.f32.mrb[178].mxu0 }
 0x2b2   : > { %3627 = vst [vmem:[%s6395_s19 + $0x10] sm:$0xff] %v3408_v63  ;;  %v3411_v18 = vadd.f32 %v4819_v59, %v6318_v22  ;;  %v4732_v17 = vpop.f32.mrb[179].mxu1  ;;  %v3402_v45 = vpop.f32.mrb[179].mxu0 }
 0x2b3   : > { %3625 = vst [vmem:[%s6395_s19] sm:$0xff] %v3400_v30  ;;  %v4733_v52 = vadd.f32 %v4732_v17, %v4731_v46  ;;  %v3403_v12 = vadd.f32 %v3402_v45, %v6306_v49  ;;  %v6402_v16 = vadd.f32 %v4730_v47, %v6297_v51 }
 0x2b4   : > { %3628 = vst [vmem:[%s6395_s19 + $0x18] sm:$0xff] %v3411_v18 }
 0x2b5   : > { %3626 = vst [vmem:[%s6395_s19 + $0x8] sm:$0xff] %v3403_v12  ;;  %v6407_v33 = vadd.f32 %v4733_v52, %v6303_v62 }
 0x2b7   : > { %v4734_v25 = vpop.f32.mrb[180].mxu1  ;;  %v4822_v37 = vpop.f32.mrb[180].mxu0 }
 0x2b8   : > { %v3424_v22 = vadd.f32 %v4822_v37, %v6336_v55  ;;  %v4735_v54 = vpop.f32.mrb[181].mxu1  ;;  %v3415_v28 = vpop.f32.mrb[181].mxu0 }
 0x2b9   : > { %v4736_v35 = vadd.f32 %v4735_v54, %v4734_v25  ;;  %v3416_v49 = vadd.f32 %v3415_v28, %v6324_v34  ;;  %v4737_v23 = vpop.f32.mrb[182].mxu1  ;;  %v4823_v51 = vpop.f32.mrb[182].mxu0 }
 0x2ba   : > { %3631 = vst [vmem:[%s6395_s19 + $0x30] sm:$0xff] %v3424_v22  ;;  %v3427_v57 = vadd.f32 %v4823_v51, %v6342_v15  ;;  %v4738_v29 = vpop.f32.mrb[183].mxu1  ;;  %v3418_v39 = vpop.f32.mrb[183].mxu0 }
 0x2bb   : > { %3629 = vst [vmem:[%s6395_s19 + $0x20] sm:$0xff] %v3416_v49  ;;  %v4739_v62 = vadd.f32 %v4738_v29, %v4737_v23  ;;  %v3419_v60 = vadd.f32 %v3418_v39, %v6330_v53  ;;  %v3311_v55 = vadd.f32 %v4736_v35, %v6309_v26 }
 0x2bc   : > { %3632 = vst [vmem:[%s6395_s19 + $0x38] sm:$0xff] %v3427_v57 }
 0x2bd   : > { %3630 = vst [vmem:[%s6395_s19 + $0x28] sm:$0xff] %v3419_v60  ;;  %v3314_v0 = vadd.f32 %v4739_v62, %v6315_v10 }
 0x2bf   : > { %v4740_v34 = vpop.f32.mrb[184].mxu1  ;;  %v4826_v20 = vpop.f32.mrb[184].mxu0 }
 0x2c0   : > { %v3440_v4 = vadd.f32 %v4826_v20, %v6360_v2  ;;  %v4741_v15 = vpop.f32.mrb[185].mxu1  ;;  %v3431_v44 = vpop.f32.mrb[185].mxu0 }
 0x2c1   : > { %v4742_v48 = vadd.f32 %v4741_v15, %v4740_v34  ;;  %v3432_v11 = vadd.f32 %v3431_v44, %v6348_v24  ;;  %v4743_v50 = vpop.f32.mrb[186].mxu1  ;;  %v4827_v53 = vpop.f32.mrb[186].mxu0 }
 0x2c2   : > { %3635 = vst [vmem:[%s6395_s19 + $0x50] sm:$0xff] %v3440_v4  ;;  %v3443_v26 = vadd.f32 %v4827_v53, %v6366_v38  ;;  %v4744_v7 = vpop.f32.mrb[187].mxu1  ;;  %v3434_v19 = vpop.f32.mrb[187].mxu0 }
 0x2c3   : > { %3633 = vst [vmem:[%s6395_s19 + $0x40] sm:$0xff] %v3432_v11  ;;  %v4745_v10 = vadd.f32 %v4744_v7, %v4743_v50  ;;  %v3435_v61 = vadd.f32 %v3434_v19, %v6354_v21  ;;  %v3319_v2 = vadd.f32 %v4742_v48, %v6321_v6 }
 0x2c4   : > { %3636 = vst [vmem:[%s6395_s19 + $0x58] sm:$0xff] %v3443_v26 }
 0x2c5   : > { %3634 = vst [vmem:[%s6395_s19 + $0x48] sm:$0xff] %v3435_v61  ;;  %v3322_v63 = vadd.f32 %v4745_v10, %v6327_v36 }
 0x2c7   : > { %v4746_v24 = vpop.f32.mrb[188].mxu1  ;;  %v4830_v13 = vpop.f32.mrb[188].mxu0 }
 0x2c8   : > { %v3456_v14 = vadd.f32 %v4830_v13, %v6384_v8  ;;  %v4747_v38 = vpop.f32.mrb[189].mxu1  ;;  %v3447_v47 = vpop.f32.mrb[189].mxu0 }
 0x2c9   : > { %v4748_v30 = vadd.f32 %v4747_v38, %v4746_v24  ;;  %v3448_v46 = vadd.f32 %v3447_v47, %v6372_v3  ;;  %v4749_v59 = vpop.f32.mrb[190].mxu1  ;;  %v4831_v21 = vpop.f32.mrb[190].mxu0 }
 0x2ca   : > { %3639 = vst [vmem:[%s6395_s19 + $0x70] sm:$0xff] %v3456_v14  ;;  %v3459_v6 = vadd.f32 %v4831_v21, %v6391_v9  ;;  %v4750_v18 = vpop.f32.mrb[191].mxu1  ;;  %v3450_v17 = vpop.f32.mrb[191].mxu0 }
 0x2cb   : > { %3637 = vst [vmem:[%s6395_s19 + $0x60] sm:$0xff] %v3448_v46  ;;  %v4751_v36 = vadd.f32 %v4750_v18, %v4749_v59  ;;  %v3451_v45 = vadd.f32 %v3450_v17, %v6378_v56  ;;  %v3327_v8 = vadd.f32 %v4748_v30, %v6333_v31 }
 0x2cc   : > { %3640 = vst [vmem:[%s6395_s19 + $0x78] sm:$0xff] %v3459_v6 }
 0x2cd   : > { %3638 = vst [vmem:[%s6395_s19 + $0x68] sm:$0xff] %v3451_v45  ;;  %v3330_v52 = vadd.f32 %v4751_v36, %v6339_v1 }
 0x2cf   : > { %v4752_v3 = vpop.f32.mrb[192].mxu1  ;;  %v4834_v12 = vpop.f32.mrb[192].mxu0 }
 0x2d0   : > { %v3472_v25 = vadd.f32 %v4834_v12, %v3311_v55  ;;  %v4753_v9 = vpop.f32.mrb[193].mxu1  ;;  %v3463_v37 = vpop.f32.mrb[193].mxu0 }
 0x2d1   : > { %v4754_v22 = vadd.f32 %v4753_v9, %v4752_v3  ;;  %v3464_v54 = vadd.f32 %v3463_v37, %v6402_v16  ;;  %v4755_v28 = vpop.f32.mrb[194].mxu1  ;;  %v4835_v35 = vpop.f32.mrb[194].mxu0 }
 0x2d2   : > { %3643 = vst [vmem:[%s6395_s19 + $0x90] sm:$0xff] %v3472_v25  ;;  %v3475_v56 = vadd.f32 %v4835_v35, %v3314_v0  ;;  %v4756_v31 = vpop.f32.mrb[195].mxu1  ;;  %v3466_v49 = vpop.f32.mrb[195].mxu0 }
 0x2d3   : > { %3641 = vst [vmem:[%s6395_s19 + $0x80] sm:$0xff] %v3464_v54  ;;  %v4757_v23 = vadd.f32 %v4756_v31, %v4755_v28  ;;  %v3467_v1 = vadd.f32 %v3466_v49, %v6407_v33  ;;  %v3335_v51 = vadd.f32 %v4754_v22, %v6345_v42 }
 0x2d4   : > { %3644 = vst [vmem:[%s6395_s19 + $0x98] sm:$0xff] %v3475_v56 }
 0x2d5   : > { %3642 = vst [vmem:[%s6395_s19 + $0x88] sm:$0xff] %v3467_v1  ;;  %v3338_v57 = vadd.f32 %v4757_v23, %v6351_v32 }
 0x2d7   : > { %v4758_v29 = vpop.f32.mrb[196].mxu1  ;;  %v4838_v16 = vpop.f32.mrb[196].mxu0 }
 0x2d8   : > { %v3488_v39 = vadd.f32 %v4838_v16, %v3327_v8  ;;  %v4759_v62 = vpop.f32.mrb[197].mxu1  ;;  %v3479_v60 = vpop.f32.mrb[197].mxu0 }
 0x2d9   : > { %v4760_v55 = vadd.f32 %v4759_v62, %v4758_v29  ;;  %v3480_v0 = vadd.f32 %v3479_v60, %v3319_v2  ;;  %v4761_v34 = vpop.f32.mrb[198].mxu1  ;;  %v4839_v20 = vpop.f32.mrb[198].mxu0 }
 0x2da   : > { %3647 = vst [vmem:[%s6395_s19 + $0xb0] sm:$0xff] %v3488_v39  ;;  %v3491_v33 = vadd.f32 %v4839_v20, %v3330_v52  ;;  %v4762_v4 = vpop.f32.mrb[199].mxu1  ;;  %v3482_v42 = vpop.f32.mrb[199].mxu0 }
 0x2db   : > { %3645 = vst [vmem:[%s6395_s19 + $0xa0] sm:$0xff] %v3480_v0  ;;  %v4763_v15 = vadd.f32 %v4762_v4, %v4761_v34  ;;  %v3483_v44 = vadd.f32 %v3482_v42, %v3322_v63  ;;  %v3343_v32 = vadd.f32 %v4760_v55, %v6357_v27 }
 0x2dc   : > { %3648 = vst [vmem:[%s6395_s19 + $0xb8] sm:$0xff] %v3491_v33 }
 0x2dd   : > { %3646 = vst [vmem:[%s6395_s19 + $0xa8] sm:$0xff] %v3483_v44  ;;  %v3346_v48 = vadd.f32 %v4763_v15, %v6363_v5 }
 0x2df   : > { %v4764_v11 = vpop.f32.mrb[200].mxu1  ;;  %v4842_v50 = vpop.f32.mrb[200].mxu0 }
 0x2e0   : > { %v3504_v53 = vadd.f32 %v4842_v50, %v3343_v32  ;;  %v4765_v26 = vpop.f32.mrb[201].mxu1  ;;  %v3495_v7 = vpop.f32.mrb[201].mxu0 }
 0x2e1   : > { %v4766_v19 = vadd.f32 %v4765_v26, %v4764_v11  ;;  %v3496_v10 = vadd.f32 %v3495_v7, %v3335_v51  ;;  %v4767_v61 = vpop.f32.mrb[202].mxu1  ;;  %v4843_v2 = vpop.f32.mrb[202].mxu0 }
 0x2e2   : > { %3651 = vst [vmem:[%s6395_s19 + $0xd0] sm:$0xff] %v3504_v53  ;;  %v3507_v63 = vadd.f32 %v4843_v2, %v3346_v48  ;;  %v4768_v24 = vpop.f32.mrb[203].mxu1  ;;  %v3498_v27 = vpop.f32.mrb[203].mxu0 }
 0x2e3   : > { %3649 = vst [vmem:[%s6395_s19 + $0xc0] sm:$0xff] %v3496_v10  ;;  %v4769_v13 = vadd.f32 %v4768_v24, %v4767_v61  ;;  %v3499_v14 = vadd.f32 %v3498_v27, %v3338_v57  ;;  %v3351_v5 = vadd.f32 %v4766_v19, %v6369_v58 }
 0x2e4   : > { %3652 = vst [vmem:[%s6395_s19 + $0xd8] sm:$0xff] %v3507_v63 }
 0x2e5   : > { %3650 = vst [vmem:[%s6395_s19 + $0xc8] sm:$0xff] %v3499_v14  ;;  %v3354_v38 = vadd.f32 %v4769_v13, %v6375_v41 }
 0x2e7   : > { %v4770_v47 = vpop.f32.mrb[204].mxu1  ;;  %v4846_v30 = vpop.f32.mrb[204].mxu0 }
 0x2e8   : > { %v4771_v46 = vpop.f32.mrb[205].mxu1  ;;  %v3511_v59 = vpop.f32.mrb[205].mxu0 }
 0x2e9   : > { %v4772_v21 = vadd.f32 %v4771_v46, %v4770_v47  ;;  %v3512_v6 = vadd.f32 %v3511_v59, %v3351_v5  ;;  %v4773_v18 = vpop.f32.mrb[206].mxu1  ;;  %v4847_v17 = vpop.f32.mrb[206].mxu0 }
 0x2ea   : > { %v4774_v36 = vpop.f32.mrb[207].mxu1  ;;  %v3514_v58 = vpop.f32.mrb[207].mxu0 }
 0x2eb   : > { %v3359_v45 = vadd.f32 %v4772_v21, %v6381_v43  ;;  %3653 = vst [vmem:[%s6395_s19 + $0xe0] sm:$0xff] %v3512_v6  ;;  %v4775_v41 = vadd.f32 %v4774_v36, %v4773_v18  ;;  %v3515_v8 = vadd.f32 %v3514_v58, %v3354_v38 }
 0x2ed   : > { %v3520_v52 = vadd.f32 %v4846_v30, %v3359_v45  ;;  %v3362_v3 = vadd.f32 %v4775_v41, %v6388_v40  ;;  %3654 = vst [vmem:[%s6395_s19 + $0xe8] sm:$0xff] %v3515_v8 }
 0x2ef   : > { %3655 = vst [vmem:[%s6395_s19 + $0xf0] sm:$0xff] %v3520_v52  ;;  %v3523_v43 = vadd.f32 %v4847_v17, %v3362_v3 }
 0x2f1   : > { %3656 = vst [vmem:[%s6395_s19 + $0xf8] sm:$0xff] %v3523_v43 }
 0x2f2   : > { %5425 = shalt.err (!%p5422_p5)
}
 0x2f3   : > { %s5426_s4 = scalar_lea.hbm %s6468_s6, 4096  ;;  %s5430_s15 = scalar_lea.hbm %s6523_s2, 8192 }
 0x2f4   : > { %p5427_p9 = scmp.ne.s32.totalorder %s6468_s6, %s5426_s4  ;;  %p5431_p3 = scmp.lt.u32.totalorder %s6468_s6, %s6523_s2 }
 0x2f5   : > { %p5432_p7 = scmp.lt.u32.totalorder %s5430_s15, %s5426_s4  ;;  %p5434_p4 = scmp.lt.u32.totalorder %s5426_s4, %s6468_s6 }
 0x2f6   : > { %p5428_p1 = pnand %p5427_p9, %p5616_p10 }
 0x2f7   : > { %p5433_p11 = por %p5432_p7, %p5431_p3 }
 0x2f8   : > { %p5429_p2 = pneg %p5428_p1 }
 0x2f9   : > { %p5435_p6 = por %p5434_p4, %p5433_p11 }
 0x2fb   : > { %p5436_p8 = pnand %p5435_p6, %p5429_p2 }
 0x2fd   : > { %5439 = shalt.err (!%p5436_p8)
}
 0x2fe   : > { %s5507_s17 = smov 128   ;;  %s5508_s19 = smov 8  }
 0x2ff   : > { %4873 = dma.vmem_to_hbm [thread:$0]  (%p5616_p10), %s6470_s30, 4096, %s6468_s6, %s3658_s27, %s5507_s17, %s5507_s17, %s5508_s19  }
 0x300 PF: > { %s3687_s21 = sand.u32 1, %s5478_s9   ;;  %p6540_p12 = scmp.ne.s32.totalorder %s6531_s20, 0 }
 0x301   : > { %p6541_p13 = scmp.ge.s32.totalorder %s5498_s14, 2  ;;  %s3688_s3 = scalar_lea.sflag [#allocation5], %s3687_s21 }
 0x303   : > { %p4884_p0 = pnand %p6541_p13, %p6540_p12 }
 0x305   : > { %5473 = dma.done.wait (!%p4884_p0), %s3688_s3, 4096  }
 0x306   : > { %5475 = vsyncadd (!%p4884_p0), %s3688_s3, 4294963200  ;;  %s19_s14 = sadd.s32 1, %s5498_s14   ;;  %s6542_s9 = smov %s5482_s10 }
 0x307   : > { %p16_p5 = scmp.ge.s32.totalorder %s19_s14, 4   ;;  %s6543_s10 = smov %s5486_s11 }
 0x308   : > { %s6544_s11 = smov %s5625_s28  ;;  %s6545_s12 = smov %s5494_s13 }
 0x309   : > { %s6546_s13 = smov %s6548_s25  ;;  %18 = sbr.rel (!%p16_p5) target bundleno = 7 (0x7), region = 86 }
 0x310   :  { %3693 = vsyncpa [#allocation4], 1 }
 0x311   :  { %3695 = vsyncpa [#allocation4 + $0x1], 1 }
 0x312   :  { %3696 = vsyncpa [#allocation7], 1 }
 0x313   :  { %3697 = vsyncpa [#allocation5], 1 }
 0x314   :  { %3699 = vsyncpa [#allocation5 + $0x1], 1 }

</bundles_post_ra>
